<compile_context>
chip_gen: v7x
topology: tpu7x:2x2x1
jax: 0.10.0
libtpu: 0.0.40
codegen_flags: <defaults>
</compile_context>

<pallas_src>
import jax
import jax.numpy as jnp
from jax.experimental import pallas as pl
from jax.experimental.pallas import tpu as pltpu


DROPOUT_P = 0.2
OUT_PAD = 128   # lane-dense padded width of the 3-wide output head


def lstm_model_kernel(x_ref,                       # VMEM (T, B, Din)
                      h0_ref, c0_ref,              # VMEM (B, H)  initial state of LSTM0
                      wih0_ref, whh0_ref, b0_ref,  # LSTM0: (Din,4H), (H,4H), (1,4H)
                      wih1_ref, whh1_ref, b1_ref,  # LSTM1: (H,4H),   (H,4H), (1,4H)
                      wout_ref, bout_ref,          # Linear (padded): (H,128), (1,128)
                      mask0_ref, mask1_ref,        # VMEM (T, B, H) scaled dropout keep-masks
                      out_ref):                    # VMEM (T, B, 128)
    T, B, Din = x_ref.shape
    H = h0_ref.shape[1]
    H4 = 4 * H

    # ---- loop-invariant loads / precompute (hoisted out of the recurrence) ----
    wih0 = wih0_ref[...]
    whh0 = whh0_ref[...]
    b0 = b0_ref[...]
    wih1 = wih1_ref[...]
    whh1 = whh1_ref[...]
    b1 = b1_ref[...]
    wout = wout_ref[...]
    bout = bout_ref[...]

    # Lane mask selecting the tanh-gate ("g") columns [2H, 3H) of the fused
    # (B, 4H) pre-activation — built once, reused every step of both layers.
    lane = jax.lax.broadcasted_iota(jnp.int32, (B, H4), dimension=1)
    is_g = (lane >= 2 * H) & (lane < 3 * H)

    def run_layer(gx, whh, h, c):
        """Serial recurrence only.  gx[t] is the precomputed (B, 4H) input
        projection (+ bias) for step t.  Returns the per-step hidden states
        (Python list of (B, H)) and the final (h, c)."""
        hs = []
        for t in range(T):                       # static unroll (T small, static)
            pre = gx[t] + jnp.dot(h, whh, preferred_element_type=jnp.float32)  # (B, 4H)
            # Full-slab EUP passes + one VPU select (gate order [i|f|g|o]).
            act = jnp.where(is_g, jnp.tanh(pre), jax.nn.sigmoid(pre))
            i = act[:, 0:H]
            f = act[:, H:2 * H]
            g = act[:, 2 * H:3 * H]
            o = act[:, 3 * H:4 * H]
            c = f * c + i * g
            h = o * jnp.tanh(c)
            hs.append(h)
        return hs, h, c

    # ---- layer 0: hoisted input projections (independent across t), then recurrence ----
    gx0 = [jnp.dot(x_ref[t], wih0, preferred_element_type=jnp.float32) + b0
           for t in range(T)]
    hs0, h_fin, c_fin = run_layer(gx0, whh0, h0_ref[...], c0_ref[...])

    # tanh + inverted-dropout mask (leading-axis indexed, clean (B,H) tiles)
    enc0 = [jnp.tanh(hs0[t]) * mask0_ref[t] for t in range(T)]

    # ---- layer 1: initial state is LSTM0's FINAL (h, c), as in the reference ----
    gx1 = [jnp.dot(enc0[t], wih1, preferred_element_type=jnp.float32) + b1
           for t in range(T)]
    hs1, _, _ = run_layer(gx1, whh1, h_fin, c_fin)

    # ---- tanh + dropout + output Linear, lane-dense (padded to 128) stores ----
    for t in range(T):
        e1 = jnp.tanh(hs1[t]) * mask1_ref[t]
        out_ref[t] = jnp.dot(e1, wout, preferred_element_type=jnp.float32) + bout


def model_forward(x, params, h0, c0, dropout_key, *, train=True):
    """x: (B, T, INPUT_DIM) float32 -> (B, T, 3) float32."""
    B, T, Din = x.shape
    H = h0.shape[-1]
    x_tm = jnp.transpose(x, (1, 0, 2))            # time-major (T, B, Din) for the kernel

    if train:
        k0, k1 = jax.random.split(dropout_key)
        keep = 1.0 - DROPOUT_P
        scale = 1.0 / keep
        mask0 = jax.random.bernoulli(k0, keep, (T, B, H)).astype(jnp.float32) * scale
        mask1 = jax.random.bernoulli(k1, keep, (T, B, H)).astype(jnp.float32) * scale
    else:
        mask0 = jnp.ones((T, B, H), jnp.float32)
        mask1 = jnp.ones((T, B, H), jnp.float32)

    out_pad = pl.pallas_call(
        lstm_model_kernel,
        out_shape=jax.ShapeDtypeStruct((T, B, OUT_PAD), jnp.float32),
        in_specs=[pl.BlockSpec(memory_space=pltpu.MemorySpace.VMEM)] * 13,
        out_specs=pl.BlockSpec(memory_space=pltpu.MemorySpace.VMEM),
    )(x_tm, h0, c0, *params, mask0, mask1)

    # slice the 3 valid lanes and go back to batch-first (B, T, 3)
    return jnp.transpose(out_pad[:, :, :3], (1, 0, 2))


def init_params(key, input_dim, hidden_dim):
    """Deterministic init matching the PyTorch parameter shapes/distribution.

    PyTorch stores weight_ih as (4H, in) and weight_hh as (4H, H) with gate
    order [i|f|g|o]; here the weights are transposed and gate-fused so the
    kernel does x @ W:  wih -> (in, 4H), whh -> (H, 4H); bias_ih and bias_hh
    are pre-summed into (1, 4H).  The nn.Linear head (3, H) is transposed to
    (H, 3) and zero-padded to (H, 128) for lane-dense stores.
    """
    s = 1.0 / jnp.sqrt(hidden_dim)
    ks = jax.random.split(key, 10)
    h4 = 4 * hidden_dim

    def u(k, shape):
        return jax.random.uniform(k, shape, jnp.float32, -s, s)

    wih0 = u(ks[0], (input_dim, h4))
    whh0 = u(ks[1], (hidden_dim, h4))
    b0 = u(ks[2], (1, h4)) + u(ks[3], (1, h4))
    wih1 = u(ks[4], (hidden_dim, h4))
    whh1 = u(ks[5], (hidden_dim, h4))
    b1 = u(ks[6], (1, h4)) + u(ks[7], (1, h4))

    wout = u(ks[8], (hidden_dim, 3))
    bout = u(ks[9], (1, 3))
    wout_pad = jnp.zeros((hidden_dim, OUT_PAD), jnp.float32).at[:, :3].set(wout)
    bout_pad = jnp.zeros((1, OUT_PAD), jnp.float32).at[:, :3].set(bout)

    return (wih0, whh0, b0, wih1, whh1, b1, wout_pad, bout_pad)


if __name__ == "__main__":
    B, T, INPUT_DIM, HIDDEN_DIM = 2, 8, 16, 64

    root = jax.random.PRNGKey(0)
    k_x, k_h, k_c, k_p, k_d = jax.random.split(root, 5)

    x = jax.random.normal(k_x, (B, T, INPUT_DIM), jnp.float32)
    # init_hidden(): torch.randn(1, B, H) for both h and c  -> squeeze to (B, H)
    h0 = jax.random.normal(k_h, (B, HIDDEN_DIM), jnp.float32)
    c0 = jax.random.normal(k_c, (B, HIDDEN_DIM), jnp.float32)
    params = init_params(k_p, INPUT_DIM, HIDDEN_DIM)

    pred = model_forward(x, params, h0, c0, k_d)
    jax.block_until_ready(pred)

    assert pred.shape == (B, T, 3), pred.shape
    print("KERNEL_OK")
</pallas_src>

<mosaic_0001>
module attributes {stable_mosaic.version = 11 : i64} {
  func.func @lstm_model_kernel(%arg0: memref<8x2x16xf32, #tpu.memory_space<vmem>>, %arg1: memref<2x64xf32, #tpu.memory_space<vmem>>, %arg2: memref<2x64xf32, #tpu.memory_space<vmem>>, %arg3: memref<16x256xf32, #tpu.memory_space<vmem>>, %arg4: memref<64x256xf32, #tpu.memory_space<vmem>>, %arg5: memref<1x256xf32, #tpu.memory_space<vmem>>, %arg6: memref<64x256xf32, #tpu.memory_space<vmem>>, %arg7: memref<64x256xf32, #tpu.memory_space<vmem>>, %arg8: memref<1x256xf32, #tpu.memory_space<vmem>>, %arg9: memref<64x128xf32, #tpu.memory_space<vmem>>, %arg10: memref<1x128xf32, #tpu.memory_space<vmem>>, %arg11: memref<8x2x64xf32, #tpu.memory_space<vmem>>, %arg12: memref<8x2x64xf32, #tpu.memory_space<vmem>>, %arg13: memref<8x2x128xf32, #tpu.memory_space<vmem>>) attributes {dimension_semantics = [], scalar_prefetch = 0 : i64, scratch_operands = 0 : i64, tpu.core_type = #tpu.core_type<tc>} {
    %c0 = arith.constant 0 : index
    %c0_0 = arith.constant 0 : index
    %0 = vector.load %arg3[%c0, %c0_0] : memref<16x256xf32, #tpu.memory_space<vmem>>, vector<16x256xf32>
    %c0_1 = arith.constant 0 : index
    %c0_2 = arith.constant 0 : index
    %1 = vector.load %arg4[%c0_1, %c0_2] : memref<64x256xf32, #tpu.memory_space<vmem>>, vector<64x256xf32>
    %c0_3 = arith.constant 0 : index
    %c0_4 = arith.constant 0 : index
    %2 = vector.load %arg5[%c0_3, %c0_4] : memref<1x256xf32, #tpu.memory_space<vmem>>, vector<1x256xf32>
    %c0_5 = arith.constant 0 : index
    %c0_6 = arith.constant 0 : index
    %3 = vector.load %arg6[%c0_5, %c0_6] : memref<64x256xf32, #tpu.memory_space<vmem>>, vector<64x256xf32>
    %c0_7 = arith.constant 0 : index
    %c0_8 = arith.constant 0 : index
    %4 = vector.load %arg7[%c0_7, %c0_8] : memref<64x256xf32, #tpu.memory_space<vmem>>, vector<64x256xf32>
    %c0_9 = arith.constant 0 : index
    %c0_10 = arith.constant 0 : index
    %5 = vector.load %arg8[%c0_9, %c0_10] : memref<1x256xf32, #tpu.memory_space<vmem>>, vector<1x256xf32>
    %c0_11 = arith.constant 0 : index
    %c0_12 = arith.constant 0 : index
    %6 = vector.load %arg9[%c0_11, %c0_12] : memref<64x128xf32, #tpu.memory_space<vmem>>, vector<64x128xf32>
    %c0_13 = arith.constant 0 : index
    %c0_14 = arith.constant 0 : index
    %7 = vector.load %arg10[%c0_13, %c0_14] : memref<1x128xf32, #tpu.memory_space<vmem>>, vector<1x128xf32>
    %8 = tpu.iota {dimensions = array<i32: 1>} : vector<2x256xi32>
    %c128_i32 = arith.constant 128 : i32
    %9 = vector.broadcast %c128_i32 : i32 to vector<2x256xi32>
    %10 = arith.cmpi sge, %8, %9 : vector<2x256xi32>
    %c192_i32 = arith.constant 192 : i32
    %11 = vector.broadcast %c192_i32 : i32 to vector<2x256xi32>
    %12 = arith.cmpi slt, %8, %11 : vector<2x256xi32>
    %13 = arith.andi %10, %12 : vector<2x256xi1>
    %c0_15 = arith.constant 0 : index
    %c0_16 = arith.constant 0 : index
    %c0_17 = arith.constant 0 : index
    %14 = vector.load %arg0[%c0_15, %c0_16, %c0_17] : memref<8x2x16xf32, #tpu.memory_space<vmem>>, vector<1x2x16xf32>
    %15 = vector.shape_cast %14 : vector<1x2x16xf32> to vector<2x16xf32>
    %cst = arith.constant dense<0.000000e+00> : vector<2x256xf32>
    %16 = tpu.matmul %15, %0, %cst {dimension_numbers = #tpu.dot_dimension_numbers<[1], [0], [0], [1], [0, 0, 1, 1], [], []>} : vector<2x16xf32>, vector<16x256xf32>, vector<2x256xf32> -> vector<2x256xf32>
    %17 = vector.broadcast %2 : vector<1x256xf32> to vector<2x256xf32>
    %18 = arith.addf %16, %17 : vector<2x256xf32>
    %c1 = arith.constant 1 : index
    %c0_18 = arith.constant 0 : index
    %c0_19 = arith.constant 0 : index
    %19 = vector.load %arg0[%c1, %c0_18, %c0_19] : memref<8x2x16xf32, #tpu.memory_space<vmem>>, vector<1x2x16xf32>
    %20 = vector.shape_cast %19 : vector<1x2x16xf32> to vector<2x16xf32>
    %cst_20 = arith.constant dense<0.000000e+00> : vector<2x256xf32>
    %21 = tpu.matmul %20, %0, %cst_20 {dimension_numbers = #tpu.dot_dimension_numbers<[1], [0], [0], [1], [0, 0, 1, 1], [], []>} : vector<2x16xf32>, vector<16x256xf32>, vector<2x256xf32> -> vector<2x256xf32>
    %22 = vector.broadcast %2 : vector<1x256xf32> to vector<2x256xf32>
    %23 = arith.addf %21, %22 : vector<2x256xf32>
    %c2 = arith.constant 2 : index
    %c0_21 = arith.constant 0 : index
    %c0_22 = arith.constant 0 : index
    %24 = vector.load %arg0[%c2, %c0_21, %c0_22] : memref<8x2x16xf32, #tpu.memory_space<vmem>>, vector<1x2x16xf32>
    %25 = vector.shape_cast %24 : vector<1x2x16xf32> to vector<2x16xf32>
    %cst_23 = arith.constant dense<0.000000e+00> : vector<2x256xf32>
    %26 = tpu.matmul %25, %0, %cst_23 {dimension_numbers = #tpu.dot_dimension_numbers<[1], [0], [0], [1], [0, 0, 1, 1], [], []>} : vector<2x16xf32>, vector<16x256xf32>, vector<2x256xf32> -> vector<2x256xf32>
    %27 = vector.broadcast %2 : vector<1x256xf32> to vector<2x256xf32>
    %28 = arith.addf %26, %27 : vector<2x256xf32>
    %c3 = arith.constant 3 : index
    %c0_24 = arith.constant 0 : index
    %c0_25 = arith.constant 0 : index
    %29 = vector.load %arg0[%c3, %c0_24, %c0_25] : memref<8x2x16xf32, #tpu.memory_space<vmem>>, vector<1x2x16xf32>
    %30 = vector.shape_cast %29 : vector<1x2x16xf32> to vector<2x16xf32>
    %cst_26 = arith.constant dense<0.000000e+00> : vector<2x256xf32>
    %31 = tpu.matmul %30, %0, %cst_26 {dimension_numbers = #tpu.dot_dimension_numbers<[1], [0], [0], [1], [0, 0, 1, 1], [], []>} : vector<2x16xf32>, vector<16x256xf32>, vector<2x256xf32> -> vector<2x256xf32>
    %32 = vector.broadcast %2 : vector<1x256xf32> to vector<2x256xf32>
    %33 = arith.addf %31, %32 : vector<2x256xf32>
    %c4 = arith.constant 4 : index
    %c0_27 = arith.constant 0 : index
    %c0_28 = arith.constant 0 : index
    %34 = vector.load %arg0[%c4, %c0_27, %c0_28] : memref<8x2x16xf32, #tpu.memory_space<vmem>>, vector<1x2x16xf32>
    %35 = vector.shape_cast %34 : vector<1x2x16xf32> to vector<2x16xf32>
    %cst_29 = arith.constant dense<0.000000e+00> : vector<2x256xf32>
    %36 = tpu.matmul %35, %0, %cst_29 {dimension_numbers = #tpu.dot_dimension_numbers<[1], [0], [0], [1], [0, 0, 1, 1], [], []>} : vector<2x16xf32>, vector<16x256xf32>, vector<2x256xf32> -> vector<2x256xf32>
    %37 = vector.broadcast %2 : vector<1x256xf32> to vector<2x256xf32>
    %38 = arith.addf %36, %37 : vector<2x256xf32>
    %c5 = arith.constant 5 : index
    %c0_30 = arith.constant 0 : index
    %c0_31 = arith.constant 0 : index
    %39 = vector.load %arg0[%c5, %c0_30, %c0_31] : memref<8x2x16xf32, #tpu.memory_space<vmem>>, vector<1x2x16xf32>
    %40 = vector.shape_cast %39 : vector<1x2x16xf32> to vector<2x16xf32>
    %cst_32 = arith.constant dense<0.000000e+00> : vector<2x256xf32>
    %41 = tpu.matmul %40, %0, %cst_32 {dimension_numbers = #tpu.dot_dimension_numbers<[1], [0], [0], [1], [0, 0, 1, 1], [], []>} : vector<2x16xf32>, vector<16x256xf32>, vector<2x256xf32> -> vector<2x256xf32>
    %42 = vector.broadcast %2 : vector<1x256xf32> to vector<2x256xf32>
    %43 = arith.addf %41, %42 : vector<2x256xf32>
    %c6 = arith.constant 6 : index
    %c0_33 = arith.constant 0 : index
    %c0_34 = arith.constant 0 : index
    %44 = vector.load %arg0[%c6, %c0_33, %c0_34] : memref<8x2x16xf32, #tpu.memory_space<vmem>>, vector<1x2x16xf32>
    %45 = vector.shape_cast %44 : vector<1x2x16xf32> to vector<2x16xf32>
    %cst_35 = arith.constant dense<0.000000e+00> : vector<2x256xf32>
    %46 = tpu.matmul %45, %0, %cst_35 {dimension_numbers = #tpu.dot_dimension_numbers<[1], [0], [0], [1], [0, 0, 1, 1], [], []>} : vector<2x16xf32>, vector<16x256xf32>, vector<2x256xf32> -> vector<2x256xf32>
    %47 = vector.broadcast %2 : vector<1x256xf32> to vector<2x256xf32>
    %48 = arith.addf %46, %47 : vector<2x256xf32>
    %c7 = arith.constant 7 : index
    %c0_36 = arith.constant 0 : index
    %c0_37 = arith.constant 0 : index
    %49 = vector.load %arg0[%c7, %c0_36, %c0_37] : memref<8x2x16xf32, #tpu.memory_space<vmem>>, vector<1x2x16xf32>
    %50 = vector.shape_cast %49 : vector<1x2x16xf32> to vector<2x16xf32>
    %cst_38 = arith.constant dense<0.000000e+00> : vector<2x256xf32>
    %51 = tpu.matmul %50, %0, %cst_38 {dimension_numbers = #tpu.dot_dimension_numbers<[1], [0], [0], [1], [0, 0, 1, 1], [], []>} : vector<2x16xf32>, vector<16x256xf32>, vector<2x256xf32> -> vector<2x256xf32>
    %52 = vector.broadcast %2 : vector<1x256xf32> to vector<2x256xf32>
    %53 = arith.addf %51, %52 : vector<2x256xf32>
    %c0_39 = arith.constant 0 : index
    %c0_40 = arith.constant 0 : index
    %54 = vector.load %arg1[%c0_39, %c0_40] : memref<2x64xf32, #tpu.memory_space<vmem>>, vector<2x64xf32>
    %c0_41 = arith.constant 0 : index
    %c0_42 = arith.constant 0 : index
    %55 = vector.load %arg2[%c0_41, %c0_42] : memref<2x64xf32, #tpu.memory_space<vmem>>, vector<2x64xf32>
    %cst_43 = arith.constant dense<0.000000e+00> : vector<2x256xf32>
    %56 = tpu.matmul %54, %1, %cst_43 {dimension_numbers = #tpu.dot_dimension_numbers<[1], [0], [0], [1], [0, 0, 1, 1], [], []>} : vector<2x64xf32>, vector<64x256xf32>, vector<2x256xf32> -> vector<2x256xf32>
    %57 = arith.addf %18, %56 : vector<2x256xf32>
    %58 = math.tanh %57 : vector<2x256xf32>
    %59 = arith.negf %57 : vector<2x256xf32>
    %60 = math.exp %59 : vector<2x256xf32>
    %cst_44 = arith.constant 1.000000e+00 : f32
    %61 = vector.broadcast %cst_44 : f32 to vector<2x256xf32>
    %62 = arith.addf %61, %60 : vector<2x256xf32>
    %63 = arith.divf %61, %62 : vector<2x256xf32>
    %64 = arith.select %13, %58, %63 : vector<2x256xi1>, vector<2x256xf32>
    %65 = vector.extract_strided_slice %64 {offsets = [0, 0], sizes = [2, 64], strides = [1, 1]} : vector<2x256xf32> to vector<2x64xf32>
    %66 = vector.extract_strided_slice %64 {offsets = [0, 64], sizes = [2, 64], strides = [1, 1]} : vector<2x256xf32> to vector<2x64xf32>
    %67 = vector.extract_strided_slice %64 {offsets = [0, 128], sizes = [2, 64], strides = [1, 1]} : vector<2x256xf32> to vector<2x64xf32>
    %68 = vector.extract_strided_slice %64 {offsets = [0, 192], sizes = [2, 64], strides = [1, 1]} : vector<2x256xf32> to vector<2x64xf32>
    %69 = arith.mulf %66, %55 : vector<2x64xf32>
    %70 = arith.mulf %65, %67 : vector<2x64xf32>
    %71 = arith.addf %69, %70 : vector<2x64xf32>
    %72 = math.tanh %71 : vector<2x64xf32>
    %73 = arith.mulf %68, %72 : vector<2x64xf32>
    %cst_45 = arith.constant dense<0.000000e+00> : vector<2x256xf32>
    %74 = tpu.matmul %73, %1, %cst_45 {dimension_numbers = #tpu.dot_dimension_numbers<[1], [0], [0], [1], [0, 0, 1, 1], [], []>} : vector<2x64xf32>, vector<64x256xf32>, vector<2x256xf32> -> vector<2x256xf32>
    %75 = arith.addf %23, %74 : vector<2x256xf32>
    %76 = math.tanh %75 : vector<2x256xf32>
    %77 = arith.negf %75 : vector<2x256xf32>
    %78 = math.exp %77 : vector<2x256xf32>
    %cst_46 = arith.constant 1.000000e+00 : f32
    %79 = vector.broadcast %cst_46 : f32 to vector<2x256xf32>
    %80 = arith.addf %79, %78 : vector<2x256xf32>
    %81 = arith.divf %79, %80 : vector<2x256xf32>
    %82 = arith.select %13, %76, %81 : vector<2x256xi1>, vector<2x256xf32>
    %83 = vector.extract_strided_slice %82 {offsets = [0, 0], sizes = [2, 64], strides = [1, 1]} : vector<2x256xf32> to vector<2x64xf32>
    %84 = vector.extract_strided_slice %82 {offsets = [0, 64], sizes = [2, 64], strides = [1, 1]} : vector<2x256xf32> to vector<2x64xf32>
    %85 = vector.extract_strided_slice %82 {offsets = [0, 128], sizes = [2, 64], strides = [1, 1]} : vector<2x256xf32> to vector<2x64xf32>
    %86 = vector.extract_strided_slice %82 {offsets = [0, 192], sizes = [2, 64], strides = [1, 1]} : vector<2x256xf32> to vector<2x64xf32>
    %87 = arith.mulf %84, %71 : vector<2x64xf32>
    %88 = arith.mulf %83, %85 : vector<2x64xf32>
    %89 = arith.addf %87, %88 : vector<2x64xf32>
    %90 = math.tanh %89 : vector<2x64xf32>
    %91 = arith.mulf %86, %90 : vector<2x64xf32>
    %cst_47 = arith.constant dense<0.000000e+00> : vector<2x256xf32>
    %92 = tpu.matmul %91, %1, %cst_47 {dimension_numbers = #tpu.dot_dimension_numbers<[1], [0], [0], [1], [0, 0, 1, 1], [], []>} : vector<2x64xf32>, vector<64x256xf32>, vector<2x256xf32> -> vector<2x256xf32>
    %93 = arith.addf %28, %92 : vector<2x256xf32>
    %94 = math.tanh %93 : vector<2x256xf32>
    %95 = arith.negf %93 : vector<2x256xf32>
    %96 = math.exp %95 : vector<2x256xf32>
    %cst_48 = arith.constant 1.000000e+00 : f32
    %97 = vector.broadcast %cst_48 : f32 to vector<2x256xf32>
    %98 = arith.addf %97, %96 : vector<2x256xf32>
    %99 = arith.divf %97, %98 : vector<2x256xf32>
    %100 = arith.select %13, %94, %99 : vector<2x256xi1>, vector<2x256xf32>
    %101 = vector.extract_strided_slice %100 {offsets = [0, 0], sizes = [2, 64], strides = [1, 1]} : vector<2x256xf32> to vector<2x64xf32>
    %102 = vector.extract_strided_slice %100 {offsets = [0, 64], sizes = [2, 64], strides = [1, 1]} : vector<2x256xf32> to vector<2x64xf32>
    %103 = vector.extract_strided_slice %100 {offsets = [0, 128], sizes = [2, 64], strides = [1, 1]} : vector<2x256xf32> to vector<2x64xf32>
    %104 = vector.extract_strided_slice %100 {offsets = [0, 192], sizes = [2, 64], strides = [1, 1]} : vector<2x256xf32> to vector<2x64xf32>
    %105 = arith.mulf %102, %89 : vector<2x64xf32>
    %106 = arith.mulf %101, %103 : vector<2x64xf32>
    %107 = arith.addf %105, %106 : vector<2x64xf32>
    %108 = math.tanh %107 : vector<2x64xf32>
    %109 = arith.mulf %104, %108 : vector<2x64xf32>
    %cst_49 = arith.constant dense<0.000000e+00> : vector<2x256xf32>
    %110 = tpu.matmul %109, %1, %cst_49 {dimension_numbers = #tpu.dot_dimension_numbers<[1], [0], [0], [1], [0, 0, 1, 1], [], []>} : vector<2x64xf32>, vector<64x256xf32>, vector<2x256xf32> -> vector<2x256xf32>
    %111 = arith.addf %33, %110 : vector<2x256xf32>
    %112 = math.tanh %111 : vector<2x256xf32>
    %113 = arith.negf %111 : vector<2x256xf32>
    %114 = math.exp %113 : vector<2x256xf32>
    %cst_50 = arith.constant 1.000000e+00 : f32
    %115 = vector.broadcast %cst_50 : f32 to vector<2x256xf32>
    %116 = arith.addf %115, %114 : vector<2x256xf32>
    %117 = arith.divf %115, %116 : vector<2x256xf32>
    %118 = arith.select %13, %112, %117 : vector<2x256xi1>, vector<2x256xf32>
    %119 = vector.extract_strided_slice %118 {offsets = [0, 0], sizes = [2, 64], strides = [1, 1]} : vector<2x256xf32> to vector<2x64xf32>
    %120 = vector.extract_strided_slice %118 {offsets = [0, 64], sizes = [2, 64], strides = [1, 1]} : vector<2x256xf32> to vector<2x64xf32>
    %121 = vector.extract_strided_slice %118 {offsets = [0, 128], sizes = [2, 64], strides = [1, 1]} : vector<2x256xf32> to vector<2x64xf32>
    %122 = vector.extract_strided_slice %118 {offsets = [0, 192], sizes = [2, 64], strides = [1, 1]} : vector<2x256xf32> to vector<2x64xf32>
    %123 = arith.mulf %120, %107 : vector<2x64xf32>
    %124 = arith.mulf %119, %121 : vector<2x64xf32>
    %125 = arith.addf %123, %124 : vector<2x64xf32>
    %126 = math.tanh %125 : vector<2x64xf32>
    %127 = arith.mulf %122, %126 : vector<2x64xf32>
    %cst_51 = arith.constant dense<0.000000e+00> : vector<2x256xf32>
    %128 = tpu.matmul %127, %1, %cst_51 {dimension_numbers = #tpu.dot_dimension_numbers<[1], [0], [0], [1], [0, 0, 1, 1], [], []>} : vector<2x64xf32>, vector<64x256xf32>, vector<2x256xf32> -> vector<2x256xf32>
    %129 = arith.addf %38, %128 : vector<2x256xf32>
    %130 = math.tanh %129 : vector<2x256xf32>
    %131 = arith.negf %129 : vector<2x256xf32>
    %132 = math.exp %131 : vector<2x256xf32>
    %cst_52 = arith.constant 1.000000e+00 : f32
    %133 = vector.broadcast %cst_52 : f32 to vector<2x256xf32>
    %134 = arith.addf %133, %132 : vector<2x256xf32>
    %135 = arith.divf %133, %134 : vector<2x256xf32>
    %136 = arith.select %13, %130, %135 : vector<2x256xi1>, vector<2x256xf32>
    %137 = vector.extract_strided_slice %136 {offsets = [0, 0], sizes = [2, 64], strides = [1, 1]} : vector<2x256xf32> to vector<2x64xf32>
    %138 = vector.extract_strided_slice %136 {offsets = [0, 64], sizes = [2, 64], strides = [1, 1]} : vector<2x256xf32> to vector<2x64xf32>
    %139 = vector.extract_strided_slice %136 {offsets = [0, 128], sizes = [2, 64], strides = [1, 1]} : vector<2x256xf32> to vector<2x64xf32>
    %140 = vector.extract_strided_slice %136 {offsets = [0, 192], sizes = [2, 64], strides = [1, 1]} : vector<2x256xf32> to vector<2x64xf32>
    %141 = arith.mulf %138, %125 : vector<2x64xf32>
    %142 = arith.mulf %137, %139 : vector<2x64xf32>
    %143 = arith.addf %141, %142 : vector<2x64xf32>
    %144 = math.tanh %143 : vector<2x64xf32>
    %145 = arith.mulf %140, %144 : vector<2x64xf32>
    %cst_53 = arith.constant dense<0.000000e+00> : vector<2x256xf32>
    %146 = tpu.matmul %145, %1, %cst_53 {dimension_numbers = #tpu.dot_dimension_numbers<[1], [0], [0], [1], [0, 0, 1, 1], [], []>} : vector<2x64xf32>, vector<64x256xf32>, vector<2x256xf32> -> vector<2x256xf32>
    %147 = arith.addf %43, %146 : vector<2x256xf32>
    %148 = math.tanh %147 : vector<2x256xf32>
    %149 = arith.negf %147 : vector<2x256xf32>
    %150 = math.exp %149 : vector<2x256xf32>
    %cst_54 = arith.constant 1.000000e+00 : f32
    %151 = vector.broadcast %cst_54 : f32 to vector<2x256xf32>
    %152 = arith.addf %151, %150 : vector<2x256xf32>
    %153 = arith.divf %151, %152 : vector<2x256xf32>
    %154 = arith.select %13, %148, %153 : vector<2x256xi1>, vector<2x256xf32>
    %155 = vector.extract_strided_slice %154 {offsets = [0, 0], sizes = [2, 64], strides = [1, 1]} : vector<2x256xf32> to vector<2x64xf32>
    %156 = vector.extract_strided_slice %154 {offsets = [0, 64], sizes = [2, 64], strides = [1, 1]} : vector<2x256xf32> to vector<2x64xf32>
    %157 = vector.extract_strided_slice %154 {offsets = [0, 128], sizes = [2, 64], strides = [1, 1]} : vector<2x256xf32> to vector<2x64xf32>
    %158 = vector.extract_strided_slice %154 {offsets = [0, 192], sizes = [2, 64], strides = [1, 1]} : vector<2x256xf32> to vector<2x64xf32>
    %159 = arith.mulf %156, %143 : vector<2x64xf32>
    %160 = arith.mulf %155, %157 : vector<2x64xf32>
    %161 = arith.addf %159, %160 : vector<2x64xf32>
    %162 = math.tanh %161 : vector<2x64xf32>
    %163 = arith.mulf %158, %162 : vector<2x64xf32>
    %cst_55 = arith.constant dense<0.000000e+00> : vector<2x256xf32>
    %164 = tpu.matmul %163, %1, %cst_55 {dimension_numbers = #tpu.dot_dimension_numbers<[1], [0], [0], [1], [0, 0, 1, 1], [], []>} : vector<2x64xf32>, vector<64x256xf32>, vector<2x256xf32> -> vector<2x256xf32>
    %165 = arith.addf %48, %164 : vector<2x256xf32>
    %166 = math.tanh %165 : vector<2x256xf32>
    %167 = arith.negf %165 : vector<2x256xf32>
    %168 = math.exp %167 : vector<2x256xf32>
    %cst_56 = arith.constant 1.000000e+00 : f32
    %169 = vector.broadcast %cst_56 : f32 to vector<2x256xf32>
    %170 = arith.addf %169, %168 : vector<2x256xf32>
    %171 = arith.divf %169, %170 : vector<2x256xf32>
    %172 = arith.select %13, %166, %171 : vector<2x256xi1>, vector<2x256xf32>
    %173 = vector.extract_strided_slice %172 {offsets = [0, 0], sizes = [2, 64], strides = [1, 1]} : vector<2x256xf32> to vector<2x64xf32>
    %174 = vector.extract_strided_slice %172 {offsets = [0, 64], sizes = [2, 64], strides = [1, 1]} : vector<2x256xf32> to vector<2x64xf32>
    %175 = vector.extract_strided_slice %172 {offsets = [0, 128], sizes = [2, 64], strides = [1, 1]} : vector<2x256xf32> to vector<2x64xf32>
    %176 = vector.extract_strided_slice %172 {offsets = [0, 192], sizes = [2, 64], strides = [1, 1]} : vector<2x256xf32> to vector<2x64xf32>
    %177 = arith.mulf %174, %161 : vector<2x64xf32>
    %178 = arith.mulf %173, %175 : vector<2x64xf32>
    %179 = arith.addf %177, %178 : vector<2x64xf32>
    %180 = math.tanh %179 : vector<2x64xf32>
    %181 = arith.mulf %176, %180 : vector<2x64xf32>
    %cst_57 = arith.constant dense<0.000000e+00> : vector<2x256xf32>
    %182 = tpu.matmul %181, %1, %cst_57 {dimension_numbers = #tpu.dot_dimension_numbers<[1], [0], [0], [1], [0, 0, 1, 1], [], []>} : vector<2x64xf32>, vector<64x256xf32>, vector<2x256xf32> -> vector<2x256xf32>
    %183 = arith.addf %53, %182 : vector<2x256xf32>
    %184 = math.tanh %183 : vector<2x256xf32>
    %185 = arith.negf %183 : vector<2x256xf32>
    %186 = math.exp %185 : vector<2x256xf32>
    %cst_58 = arith.constant 1.000000e+00 : f32
    %187 = vector.broadcast %cst_58 : f32 to vector<2x256xf32>
    %188 = arith.addf %187, %186 : vector<2x256xf32>
    %189 = arith.divf %187, %188 : vector<2x256xf32>
    %190 = arith.select %13, %184, %189 : vector<2x256xi1>, vector<2x256xf32>
    %191 = vector.extract_strided_slice %190 {offsets = [0, 0], sizes = [2, 64], strides = [1, 1]} : vector<2x256xf32> to vector<2x64xf32>
    %192 = vector.extract_strided_slice %190 {offsets = [0, 64], sizes = [2, 64], strides = [1, 1]} : vector<2x256xf32> to vector<2x64xf32>
    %193 = vector.extract_strided_slice %190 {offsets = [0, 128], sizes = [2, 64], strides = [1, 1]} : vector<2x256xf32> to vector<2x64xf32>
    %194 = vector.extract_strided_slice %190 {offsets = [0, 192], sizes = [2, 64], strides = [1, 1]} : vector<2x256xf32> to vector<2x64xf32>
    %195 = arith.mulf %192, %179 : vector<2x64xf32>
    %196 = arith.mulf %191, %193 : vector<2x64xf32>
    %197 = arith.addf %195, %196 : vector<2x64xf32>
    %198 = math.tanh %197 : vector<2x64xf32>
    %199 = arith.mulf %194, %198 : vector<2x64xf32>
    %200 = math.tanh %73 : vector<2x64xf32>
    %c0_59 = arith.constant 0 : index
    %c0_60 = arith.constant 0 : index
    %c0_61 = arith.constant 0 : index
    %201 = vector.load %arg11[%c0_59, %c0_60, %c0_61] : memref<8x2x64xf32, #tpu.memory_space<vmem>>, vector<1x2x64xf32>
    %202 = vector.shape_cast %201 : vector<1x2x64xf32> to vector<2x64xf32>
    %203 = arith.mulf %200, %202 : vector<2x64xf32>
    %204 = math.tanh %91 : vector<2x64xf32>
    %c1_62 = arith.constant 1 : index
    %c0_63 = arith.constant 0 : index
    %c0_64 = arith.constant 0 : index
    %205 = vector.load %arg11[%c1_62, %c0_63, %c0_64] : memref<8x2x64xf32, #tpu.memory_space<vmem>>, vector<1x2x64xf32>
    %206 = vector.shape_cast %205 : vector<1x2x64xf32> to vector<2x64xf32>
    %207 = arith.mulf %204, %206 : vector<2x64xf32>
    %208 = math.tanh %109 : vector<2x64xf32>
    %c2_65 = arith.constant 2 : index
    %c0_66 = arith.constant 0 : index
    %c0_67 = arith.constant 0 : index
    %209 = vector.load %arg11[%c2_65, %c0_66, %c0_67] : memref<8x2x64xf32, #tpu.memory_space<vmem>>, vector<1x2x64xf32>
    %210 = vector.shape_cast %209 : vector<1x2x64xf32> to vector<2x64xf32>
    %211 = arith.mulf %208, %210 : vector<2x64xf32>
    %212 = math.tanh %127 : vector<2x64xf32>
    %c3_68 = arith.constant 3 : index
    %c0_69 = arith.constant 0 : index
    %c0_70 = arith.constant 0 : index
    %213 = vector.load %arg11[%c3_68, %c0_69, %c0_70] : memref<8x2x64xf32, #tpu.memory_space<vmem>>, vector<1x2x64xf32>
    %214 = vector.shape_cast %213 : vector<1x2x64xf32> to vector<2x64xf32>
    %215 = arith.mulf %212, %214 : vector<2x64xf32>
    %216 = math.tanh %145 : vector<2x64xf32>
    %c4_71 = arith.constant 4 : index
    %c0_72 = arith.constant 0 : index
    %c0_73 = arith.constant 0 : index
    %217 = vector.load %arg11[%c4_71, %c0_72, %c0_73] : memref<8x2x64xf32, #tpu.memory_space<vmem>>, vector<1x2x64xf32>
    %218 = vector.shape_cast %217 : vector<1x2x64xf32> to vector<2x64xf32>
    %219 = arith.mulf %216, %218 : vector<2x64xf32>
    %220 = math.tanh %163 : vector<2x64xf32>
    %c5_74 = arith.constant 5 : index
    %c0_75 = arith.constant 0 : index
    %c0_76 = arith.constant 0 : index
    %221 = vector.load %arg11[%c5_74, %c0_75, %c0_76] : memref<8x2x64xf32, #tpu.memory_space<vmem>>, vector<1x2x64xf32>
    %222 = vector.shape_cast %221 : vector<1x2x64xf32> to vector<2x64xf32>
    %223 = arith.mulf %220, %222 : vector<2x64xf32>
    %224 = math.tanh %181 : vector<2x64xf32>
    %c6_77 = arith.constant 6 : index
    %c0_78 = arith.constant 0 : index
    %c0_79 = arith.constant 0 : index
    %225 = vector.load %arg11[%c6_77, %c0_78, %c0_79] : memref<8x2x64xf32, #tpu.memory_space<vmem>>, vector<1x2x64xf32>
    %226 = vector.shape_cast %225 : vector<1x2x64xf32> to vector<2x64xf32>
    %227 = arith.mulf %224, %226 : vector<2x64xf32>
    %228 = math.tanh %199 : vector<2x64xf32>
    %c7_80 = arith.constant 7 : index
    %c0_81 = arith.constant 0 : index
    %c0_82 = arith.constant 0 : index
    %229 = vector.load %arg11[%c7_80, %c0_81, %c0_82] : memref<8x2x64xf32, #tpu.memory_space<vmem>>, vector<1x2x64xf32>
    %230 = vector.shape_cast %229 : vector<1x2x64xf32> to vector<2x64xf32>
    %231 = arith.mulf %228, %230 : vector<2x64xf32>
    %cst_83 = arith.constant dense<0.000000e+00> : vector<2x256xf32>
    %232 = tpu.matmul %203, %3, %cst_83 {dimension_numbers = #tpu.dot_dimension_numbers<[1], [0], [0], [1], [0, 0, 1, 1], [], []>} : vector<2x64xf32>, vector<64x256xf32>, vector<2x256xf32> -> vector<2x256xf32>
    %233 = vector.broadcast %5 : vector<1x256xf32> to vector<2x256xf32>
    %234 = arith.addf %232, %233 : vector<2x256xf32>
    %cst_84 = arith.constant dense<0.000000e+00> : vector<2x256xf32>
    %235 = tpu.matmul %207, %3, %cst_84 {dimension_numbers = #tpu.dot_dimension_numbers<[1], [0], [0], [1], [0, 0, 1, 1], [], []>} : vector<2x64xf32>, vector<64x256xf32>, vector<2x256xf32> -> vector<2x256xf32>
    %236 = vector.broadcast %5 : vector<1x256xf32> to vector<2x256xf32>
    %237 = arith.addf %235, %236 : vector<2x256xf32>
    %cst_85 = arith.constant dense<0.000000e+00> : vector<2x256xf32>
    %238 = tpu.matmul %211, %3, %cst_85 {dimension_numbers = #tpu.dot_dimension_numbers<[1], [0], [0], [1], [0, 0, 1, 1], [], []>} : vector<2x64xf32>, vector<64x256xf32>, vector<2x256xf32> -> vector<2x256xf32>
    %239 = vector.broadcast %5 : vector<1x256xf32> to vector<2x256xf32>
    %240 = arith.addf %238, %239 : vector<2x256xf32>
    %cst_86 = arith.constant dense<0.000000e+00> : vector<2x256xf32>
    %241 = tpu.matmul %215, %3, %cst_86 {dimension_numbers = #tpu.dot_dimension_numbers<[1], [0], [0], [1], [0, 0, 1, 1], [], []>} : vector<2x64xf32>, vector<64x256xf32>, vector<2x256xf32> -> vector<2x256xf32>
    %242 = vector.broadcast %5 : vector<1x256xf32> to vector<2x256xf32>
    %243 = arith.addf %241, %242 : vector<2x256xf32>
    %cst_87 = arith.constant dense<0.000000e+00> : vector<2x256xf32>
    %244 = tpu.matmul %219, %3, %cst_87 {dimension_numbers = #tpu.dot_dimension_numbers<[1], [0], [0], [1], [0, 0, 1, 1], [], []>} : vector<2x64xf32>, vector<64x256xf32>, vector<2x256xf32> -> vector<2x256xf32>
    %245 = vector.broadcast %5 : vector<1x256xf32> to vector<2x256xf32>
    %246 = arith.addf %244, %245 : vector<2x256xf32>
    %cst_88 = arith.constant dense<0.000000e+00> : vector<2x256xf32>
    %247 = tpu.matmul %223, %3, %cst_88 {dimension_numbers = #tpu.dot_dimension_numbers<[1], [0], [0], [1], [0, 0, 1, 1], [], []>} : vector<2x64xf32>, vector<64x256xf32>, vector<2x256xf32> -> vector<2x256xf32>
    %248 = vector.broadcast %5 : vector<1x256xf32> to vector<2x256xf32>
    %249 = arith.addf %247, %248 : vector<2x256xf32>
    %cst_89 = arith.constant dense<0.000000e+00> : vector<2x256xf32>
    %250 = tpu.matmul %227, %3, %cst_89 {dimension_numbers = #tpu.dot_dimension_numbers<[1], [0], [0], [1], [0, 0, 1, 1], [], []>} : vector<2x64xf32>, vector<64x256xf32>, vector<2x256xf32> -> vector<2x256xf32>
    %251 = vector.broadcast %5 : vector<1x256xf32> to vector<2x256xf32>
    %252 = arith.addf %250, %251 : vector<2x256xf32>
    %cst_90 = arith.constant dense<0.000000e+00> : vector<2x256xf32>
    %253 = tpu.matmul %231, %3, %cst_90 {dimension_numbers = #tpu.dot_dimension_numbers<[1], [0], [0], [1], [0, 0, 1, 1], [], []>} : vector<2x64xf32>, vector<64x256xf32>, vector<2x256xf32> -> vector<2x256xf32>
    %254 = vector.broadcast %5 : vector<1x256xf32> to vector<2x256xf32>
    %255 = arith.addf %253, %254 : vector<2x256xf32>
    %cst_91 = arith.constant dense<0.000000e+00> : vector<2x256xf32>
    %256 = tpu.matmul %199, %4, %cst_91 {dimension_numbers = #tpu.dot_dimension_numbers<[1], [0], [0], [1], [0, 0, 1, 1], [], []>} : vector<2x64xf32>, vector<64x256xf32>, vector<2x256xf32> -> vector<2x256xf32>
    %257 = arith.addf %234, %256 : vector<2x256xf32>
    %258 = math.tanh %257 : vector<2x256xf32>
    %259 = arith.negf %257 : vector<2x256xf32>
    %260 = math.exp %259 : vector<2x256xf32>
    %cst_92 = arith.constant 1.000000e+00 : f32
    %261 = vector.broadcast %cst_92 : f32 to vector<2x256xf32>
    %262 = arith.addf %261, %260 : vector<2x256xf32>
    %263 = arith.divf %261, %262 : vector<2x256xf32>
    %264 = arith.select %13, %258, %263 : vector<2x256xi1>, vector<2x256xf32>
    %265 = vector.extract_strided_slice %264 {offsets = [0, 0], sizes = [2, 64], strides = [1, 1]} : vector<2x256xf32> to vector<2x64xf32>
    %266 = vector.extract_strided_slice %264 {offsets = [0, 64], sizes = [2, 64], strides = [1, 1]} : vector<2x256xf32> to vector<2x64xf32>
    %267 = vector.extract_strided_slice %264 {offsets = [0, 128], sizes = [2, 64], strides = [1, 1]} : vector<2x256xf32> to vector<2x64xf32>
    %268 = vector.extract_strided_slice %264 {offsets = [0, 192], sizes = [2, 64], strides = [1, 1]} : vector<2x256xf32> to vector<2x64xf32>
    %269 = arith.mulf %266, %197 : vector<2x64xf32>
    %270 = arith.mulf %265, %267 : vector<2x64xf32>
    %271 = arith.addf %269, %270 : vector<2x64xf32>
    %272 = math.tanh %271 : vector<2x64xf32>
    %273 = arith.mulf %268, %272 : vector<2x64xf32>
    %cst_93 = arith.constant dense<0.000000e+00> : vector<2x256xf32>
    %274 = tpu.matmul %273, %4, %cst_93 {dimension_numbers = #tpu.dot_dimension_numbers<[1], [0], [0], [1], [0, 0, 1, 1], [], []>} : vector<2x64xf32>, vector<64x256xf32>, vector<2x256xf32> -> vector<2x256xf32>
    %275 = arith.addf %237, %274 : vector<2x256xf32>
    %276 = math.tanh %275 : vector<2x256xf32>
    %277 = arith.negf %275 : vector<2x256xf32>
    %278 = math.exp %277 : vector<2x256xf32>
    %cst_94 = arith.constant 1.000000e+00 : f32
    %279 = vector.broadcast %cst_94 : f32 to vector<2x256xf32>
    %280 = arith.addf %279, %278 : vector<2x256xf32>
    %281 = arith.divf %279, %280 : vector<2x256xf32>
    %282 = arith.select %13, %276, %281 : vector<2x256xi1>, vector<2x256xf32>
    %283 = vector.extract_strided_slice %282 {offsets = [0, 0], sizes = [2, 64], strides = [1, 1]} : vector<2x256xf32> to vector<2x64xf32>
    %284 = vector.extract_strided_slice %282 {offsets = [0, 64], sizes = [2, 64], strides = [1, 1]} : vector<2x256xf32> to vector<2x64xf32>
    %285 = vector.extract_strided_slice %282 {offsets = [0, 128], sizes = [2, 64], strides = [1, 1]} : vector<2x256xf32> to vector<2x64xf32>
    %286 = vector.extract_strided_slice %282 {offsets = [0, 192], sizes = [2, 64], strides = [1, 1]} : vector<2x256xf32> to vector<2x64xf32>
    %287 = arith.mulf %284, %271 : vector<2x64xf32>
    %288 = arith.mulf %283, %285 : vector<2x64xf32>
    %289 = arith.addf %287, %288 : vector<2x64xf32>
    %290 = math.tanh %289 : vector<2x64xf32>
    %291 = arith.mulf %286, %290 : vector<2x64xf32>
    %cst_95 = arith.constant dense<0.000000e+00> : vector<2x256xf32>
    %292 = tpu.matmul %291, %4, %cst_95 {dimension_numbers = #tpu.dot_dimension_numbers<[1], [0], [0], [1], [0, 0, 1, 1], [], []>} : vector<2x64xf32>, vector<64x256xf32>, vector<2x256xf32> -> vector<2x256xf32>
    %293 = arith.addf %240, %292 : vector<2x256xf32>
    %294 = math.tanh %293 : vector<2x256xf32>
    %295 = arith.negf %293 : vector<2x256xf32>
    %296 = math.exp %295 : vector<2x256xf32>
    %cst_96 = arith.constant 1.000000e+00 : f32
    %297 = vector.broadcast %cst_96 : f32 to vector<2x256xf32>
    %298 = arith.addf %297, %296 : vector<2x256xf32>
    %299 = arith.divf %297, %298 : vector<2x256xf32>
    %300 = arith.select %13, %294, %299 : vector<2x256xi1>, vector<2x256xf32>
    %301 = vector.extract_strided_slice %300 {offsets = [0, 0], sizes = [2, 64], strides = [1, 1]} : vector<2x256xf32> to vector<2x64xf32>
    %302 = vector.extract_strided_slice %300 {offsets = [0, 64], sizes = [2, 64], strides = [1, 1]} : vector<2x256xf32> to vector<2x64xf32>
    %303 = vector.extract_strided_slice %300 {offsets = [0, 128], sizes = [2, 64], strides = [1, 1]} : vector<2x256xf32> to vector<2x64xf32>
    %304 = vector.extract_strided_slice %300 {offsets = [0, 192], sizes = [2, 64], strides = [1, 1]} : vector<2x256xf32> to vector<2x64xf32>
    %305 = arith.mulf %302, %289 : vector<2x64xf32>
    %306 = arith.mulf %301, %303 : vector<2x64xf32>
    %307 = arith.addf %305, %306 : vector<2x64xf32>
    %308 = math.tanh %307 : vector<2x64xf32>
    %309 = arith.mulf %304, %308 : vector<2x64xf32>
    %cst_97 = arith.constant dense<0.000000e+00> : vector<2x256xf32>
    %310 = tpu.matmul %309, %4, %cst_97 {dimension_numbers = #tpu.dot_dimension_numbers<[1], [0], [0], [1], [0, 0, 1, 1], [], []>} : vector<2x64xf32>, vector<64x256xf32>, vector<2x256xf32> -> vector<2x256xf32>
    %311 = arith.addf %243, %310 : vector<2x256xf32>
    %312 = math.tanh %311 : vector<2x256xf32>
    %313 = arith.negf %311 : vector<2x256xf32>
    %314 = math.exp %313 : vector<2x256xf32>
    %cst_98 = arith.constant 1.000000e+00 : f32
    %315 = vector.broadcast %cst_98 : f32 to vector<2x256xf32>
    %316 = arith.addf %315, %314 : vector<2x256xf32>
    %317 = arith.divf %315, %316 : vector<2x256xf32>
    %318 = arith.select %13, %312, %317 : vector<2x256xi1>, vector<2x256xf32>
    %319 = vector.extract_strided_slice %318 {offsets = [0, 0], sizes = [2, 64], strides = [1, 1]} : vector<2x256xf32> to vector<2x64xf32>
    %320 = vector.extract_strided_slice %318 {offsets = [0, 64], sizes = [2, 64], strides = [1, 1]} : vector<2x256xf32> to vector<2x64xf32>
    %321 = vector.extract_strided_slice %318 {offsets = [0, 128], sizes = [2, 64], strides = [1, 1]} : vector<2x256xf32> to vector<2x64xf32>
    %322 = vector.extract_strided_slice %318 {offsets = [0, 192], sizes = [2, 64], strides = [1, 1]} : vector<2x256xf32> to vector<2x64xf32>
    %323 = arith.mulf %320, %307 : vector<2x64xf32>
    %324 = arith.mulf %319, %321 : vector<2x64xf32>
    %325 = arith.addf %323, %324 : vector<2x64xf32>
    %326 = math.tanh %325 : vector<2x64xf32>
    %327 = arith.mulf %322, %326 : vector<2x64xf32>
    %cst_99 = arith.constant dense<0.000000e+00> : vector<2x256xf32>
    %328 = tpu.matmul %327, %4, %cst_99 {dimension_numbers = #tpu.dot_dimension_numbers<[1], [0], [0], [1], [0, 0, 1, 1], [], []>} : vector<2x64xf32>, vector<64x256xf32>, vector<2x256xf32> -> vector<2x256xf32>
    %329 = arith.addf %246, %328 : vector<2x256xf32>
    %330 = math.tanh %329 : vector<2x256xf32>
    %331 = arith.negf %329 : vector<2x256xf32>
    %332 = math.exp %331 : vector<2x256xf32>
    %cst_100 = arith.constant 1.000000e+00 : f32
    %333 = vector.broadcast %cst_100 : f32 to vector<2x256xf32>
    %334 = arith.addf %333, %332 : vector<2x256xf32>
    %335 = arith.divf %333, %334 : vector<2x256xf32>
    %336 = arith.select %13, %330, %335 : vector<2x256xi1>, vector<2x256xf32>
    %337 = vector.extract_strided_slice %336 {offsets = [0, 0], sizes = [2, 64], strides = [1, 1]} : vector<2x256xf32> to vector<2x64xf32>
    %338 = vector.extract_strided_slice %336 {offsets = [0, 64], sizes = [2, 64], strides = [1, 1]} : vector<2x256xf32> to vector<2x64xf32>
    %339 = vector.extract_strided_slice %336 {offsets = [0, 128], sizes = [2, 64], strides = [1, 1]} : vector<2x256xf32> to vector<2x64xf32>
    %340 = vector.extract_strided_slice %336 {offsets = [0, 192], sizes = [2, 64], strides = [1, 1]} : vector<2x256xf32> to vector<2x64xf32>
    %341 = arith.mulf %338, %325 : vector<2x64xf32>
    %342 = arith.mulf %337, %339 : vector<2x64xf32>
    %343 = arith.addf %341, %342 : vector<2x64xf32>
    %344 = math.tanh %343 : vector<2x64xf32>
    %345 = arith.mulf %340, %344 : vector<2x64xf32>
    %cst_101 = arith.constant dense<0.000000e+00> : vector<2x256xf32>
    %346 = tpu.matmul %345, %4, %cst_101 {dimension_numbers = #tpu.dot_dimension_numbers<[1], [0], [0], [1], [0, 0, 1, 1], [], []>} : vector<2x64xf32>, vector<64x256xf32>, vector<2x256xf32> -> vector<2x256xf32>
    %347 = arith.addf %249, %346 : vector<2x256xf32>
    %348 = math.tanh %347 : vector<2x256xf32>
    %349 = arith.negf %347 : vector<2x256xf32>
    %350 = math.exp %349 : vector<2x256xf32>
    %cst_102 = arith.constant 1.000000e+00 : f32
    %351 = vector.broadcast %cst_102 : f32 to vector<2x256xf32>
    %352 = arith.addf %351, %350 : vector<2x256xf32>
    %353 = arith.divf %351, %352 : vector<2x256xf32>
    %354 = arith.select %13, %348, %353 : vector<2x256xi1>, vector<2x256xf32>
    %355 = vector.extract_strided_slice %354 {offsets = [0, 0], sizes = [2, 64], strides = [1, 1]} : vector<2x256xf32> to vector<2x64xf32>
    %356 = vector.extract_strided_slice %354 {offsets = [0, 64], sizes = [2, 64], strides = [1, 1]} : vector<2x256xf32> to vector<2x64xf32>
    %357 = vector.extract_strided_slice %354 {offsets = [0, 128], sizes = [2, 64], strides = [1, 1]} : vector<2x256xf32> to vector<2x64xf32>
    %358 = vector.extract_strided_slice %354 {offsets = [0, 192], sizes = [2, 64], strides = [1, 1]} : vector<2x256xf32> to vector<2x64xf32>
    %359 = arith.mulf %356, %343 : vector<2x64xf32>
    %360 = arith.mulf %355, %357 : vector<2x64xf32>
    %361 = arith.addf %359, %360 : vector<2x64xf32>
    %362 = math.tanh %361 : vector<2x64xf32>
    %363 = arith.mulf %358, %362 : vector<2x64xf32>
    %cst_103 = arith.constant dense<0.000000e+00> : vector<2x256xf32>
    %364 = tpu.matmul %363, %4, %cst_103 {dimension_numbers = #tpu.dot_dimension_numbers<[1], [0], [0], [1], [0, 0, 1, 1], [], []>} : vector<2x64xf32>, vector<64x256xf32>, vector<2x256xf32> -> vector<2x256xf32>
    %365 = arith.addf %252, %364 : vector<2x256xf32>
    %366 = math.tanh %365 : vector<2x256xf32>
    %367 = arith.negf %365 : vector<2x256xf32>
    %368 = math.exp %367 : vector<2x256xf32>
    %cst_104 = arith.constant 1.000000e+00 : f32
    %369 = vector.broadcast %cst_104 : f32 to vector<2x256xf32>
    %370 = arith.addf %369, %368 : vector<2x256xf32>
    %371 = arith.divf %369, %370 : vector<2x256xf32>
    %372 = arith.select %13, %366, %371 : vector<2x256xi1>, vector<2x256xf32>
    %373 = vector.extract_strided_slice %372 {offsets = [0, 0], sizes = [2, 64], strides = [1, 1]} : vector<2x256xf32> to vector<2x64xf32>
    %374 = vector.extract_strided_slice %372 {offsets = [0, 64], sizes = [2, 64], strides = [1, 1]} : vector<2x256xf32> to vector<2x64xf32>
    %375 = vector.extract_strided_slice %372 {offsets = [0, 128], sizes = [2, 64], strides = [1, 1]} : vector<2x256xf32> to vector<2x64xf32>
    %376 = vector.extract_strided_slice %372 {offsets = [0, 192], sizes = [2, 64], strides = [1, 1]} : vector<2x256xf32> to vector<2x64xf32>
    %377 = arith.mulf %374, %361 : vector<2x64xf32>
    %378 = arith.mulf %373, %375 : vector<2x64xf32>
    %379 = arith.addf %377, %378 : vector<2x64xf32>
    %380 = math.tanh %379 : vector<2x64xf32>
    %381 = arith.mulf %376, %380 : vector<2x64xf32>
    %cst_105 = arith.constant dense<0.000000e+00> : vector<2x256xf32>
    %382 = tpu.matmul %381, %4, %cst_105 {dimension_numbers = #tpu.dot_dimension_numbers<[1], [0], [0], [1], [0, 0, 1, 1], [], []>} : vector<2x64xf32>, vector<64x256xf32>, vector<2x256xf32> -> vector<2x256xf32>
    %383 = arith.addf %255, %382 : vector<2x256xf32>
    %384 = math.tanh %383 : vector<2x256xf32>
    %385 = arith.negf %383 : vector<2x256xf32>
    %386 = math.exp %385 : vector<2x256xf32>
    %cst_106 = arith.constant 1.000000e+00 : f32
    %387 = vector.broadcast %cst_106 : f32 to vector<2x256xf32>
    %388 = arith.addf %387, %386 : vector<2x256xf32>
    %389 = arith.divf %387, %388 : vector<2x256xf32>
    %390 = arith.select %13, %384, %389 : vector<2x256xi1>, vector<2x256xf32>
    %391 = vector.extract_strided_slice %390 {offsets = [0, 0], sizes = [2, 64], strides = [1, 1]} : vector<2x256xf32> to vector<2x64xf32>
    %392 = vector.extract_strided_slice %390 {offsets = [0, 64], sizes = [2, 64], strides = [1, 1]} : vector<2x256xf32> to vector<2x64xf32>
    %393 = vector.extract_strided_slice %390 {offsets = [0, 128], sizes = [2, 64], strides = [1, 1]} : vector<2x256xf32> to vector<2x64xf32>
    %394 = vector.extract_strided_slice %390 {offsets = [0, 192], sizes = [2, 64], strides = [1, 1]} : vector<2x256xf32> to vector<2x64xf32>
    %395 = arith.mulf %392, %379 : vector<2x64xf32>
    %396 = arith.mulf %391, %393 : vector<2x64xf32>
    %397 = arith.addf %395, %396 : vector<2x64xf32>
    %398 = math.tanh %397 : vector<2x64xf32>
    %399 = arith.mulf %394, %398 : vector<2x64xf32>
    %400 = math.tanh %273 : vector<2x64xf32>
    %c0_107 = arith.constant 0 : index
    %c0_108 = arith.constant 0 : index
    %c0_109 = arith.constant 0 : index
    %401 = vector.load %arg12[%c0_107, %c0_108, %c0_109] : memref<8x2x64xf32, #tpu.memory_space<vmem>>, vector<1x2x64xf32>
    %402 = vector.shape_cast %401 : vector<1x2x64xf32> to vector<2x64xf32>
    %403 = arith.mulf %400, %402 : vector<2x64xf32>
    %cst_110 = arith.constant dense<0.000000e+00> : vector<2x128xf32>
    %404 = tpu.matmul %403, %6, %cst_110 {dimension_numbers = #tpu.dot_dimension_numbers<[1], [0], [0], [1], [0, 0, 1, 1], [], []>} : vector<2x64xf32>, vector<64x128xf32>, vector<2x128xf32> -> vector<2x128xf32>
    %405 = vector.broadcast %7 : vector<1x128xf32> to vector<2x128xf32>
    %406 = arith.addf %404, %405 : vector<2x128xf32>
    %c0_111 = arith.constant 0 : index
    %c0_112 = arith.constant 0 : index
    %c0_113 = arith.constant 0 : index
    %407 = vector.load %arg13[%c0_111, %c0_112, %c0_113] : memref<8x2x128xf32, #tpu.memory_space<vmem>>, vector<1x2x128xf32>
    %408 = vector.shape_cast %407 : vector<1x2x128xf32> to vector<2x128xf32>
    %409 = vector.shape_cast %406 : vector<2x128xf32> to vector<1x2x128xf32>
    tpu.vector_store %arg13[%c0_111, %c0_112, %c0_113], %409 {strides = array<i32>} : memref<8x2x128xf32, #tpu.memory_space<vmem>>, vector<1x2x128xf32>,
    %410 = math.tanh %291 : vector<2x64xf32>
    %c1_114 = arith.constant 1 : index
    %c0_115 = arith.constant 0 : index
    %c0_116 = arith.constant 0 : index
    %411 = vector.load %arg12[%c1_114, %c0_115, %c0_116] : memref<8x2x64xf32, #tpu.memory_space<vmem>>, vector<1x2x64xf32>
    %412 = vector.shape_cast %411 : vector<1x2x64xf32> to vector<2x64xf32>
    %413 = arith.mulf %410, %412 : vector<2x64xf32>
    %cst_117 = arith.constant dense<0.000000e+00> : vector<2x128xf32>
    %414 = tpu.matmul %413, %6, %cst_117 {dimension_numbers = #tpu.dot_dimension_numbers<[1], [0], [0], [1], [0, 0, 1, 1], [], []>} : vector<2x64xf32>, vector<64x128xf32>, vector<2x128xf32> -> vector<2x128xf32>
    %415 = vector.broadcast %7 : vector<1x128xf32> to vector<2x128xf32>
    %416 = arith.addf %414, %415 : vector<2x128xf32>
    %c1_118 = arith.constant 1 : index
    %c0_119 = arith.constant 0 : index
    %c0_120 = arith.constant 0 : index
    %417 = vector.load %arg13[%c1_118, %c0_119, %c0_120] : memref<8x2x128xf32, #tpu.memory_space<vmem>>, vector<1x2x128xf32>
    %418 = vector.shape_cast %417 : vector<1x2x128xf32> to vector<2x128xf32>
    %419 = vector.shape_cast %416 : vector<2x128xf32> to vector<1x2x128xf32>
    tpu.vector_store %arg13[%c1_118, %c0_119, %c0_120], %419 {strides = array<i32>} : memref<8x2x128xf32, #tpu.memory_space<vmem>>, vector<1x2x128xf32>,
    %420 = math.tanh %309 : vector<2x64xf32>
    %c2_121 = arith.constant 2 : index
    %c0_122 = arith.constant 0 : index
    %c0_123 = arith.constant 0 : index
    %421 = vector.load %arg12[%c2_121, %c0_122, %c0_123] : memref<8x2x64xf32, #tpu.memory_space<vmem>>, vector<1x2x64xf32>
    %422 = vector.shape_cast %421 : vector<1x2x64xf32> to vector<2x64xf32>
    %423 = arith.mulf %420, %422 : vector<2x64xf32>
    %cst_124 = arith.constant dense<0.000000e+00> : vector<2x128xf32>
    %424 = tpu.matmul %423, %6, %cst_124 {dimension_numbers = #tpu.dot_dimension_numbers<[1], [0], [0], [1], [0, 0, 1, 1], [], []>} : vector<2x64xf32>, vector<64x128xf32>, vector<2x128xf32> -> vector<2x128xf32>
    %425 = vector.broadcast %7 : vector<1x128xf32> to vector<2x128xf32>
    %426 = arith.addf %424, %425 : vector<2x128xf32>
    %c2_125 = arith.constant 2 : index
    %c0_126 = arith.constant 0 : index
    %c0_127 = arith.constant 0 : index
    %427 = vector.load %arg13[%c2_125, %c0_126, %c0_127] : memref<8x2x128xf32, #tpu.memory_space<vmem>>, vector<1x2x128xf32>
    %428 = vector.shape_cast %427 : vector<1x2x128xf32> to vector<2x128xf32>
    %429 = vector.shape_cast %426 : vector<2x128xf32> to vector<1x2x128xf32>
    tpu.vector_store %arg13[%c2_125, %c0_126, %c0_127], %429 {strides = array<i32>} : memref<8x2x128xf32, #tpu.memory_space<vmem>>, vector<1x2x128xf32>,
    %430 = math.tanh %327 : vector<2x64xf32>
    %c3_128 = arith.constant 3 : index
    %c0_129 = arith.constant 0 : index
    %c0_130 = arith.constant 0 : index
    %431 = vector.load %arg12[%c3_128, %c0_129, %c0_130] : memref<8x2x64xf32, #tpu.memory_space<vmem>>, vector<1x2x64xf32>
    %432 = vector.shape_cast %431 : vector<1x2x64xf32> to vector<2x64xf32>
    %433 = arith.mulf %430, %432 : vector<2x64xf32>
    %cst_131 = arith.constant dense<0.000000e+00> : vector<2x128xf32>
    %434 = tpu.matmul %433, %6, %cst_131 {dimension_numbers = #tpu.dot_dimension_numbers<[1], [0], [0], [1], [0, 0, 1, 1], [], []>} : vector<2x64xf32>, vector<64x128xf32>, vector<2x128xf32> -> vector<2x128xf32>
    %435 = vector.broadcast %7 : vector<1x128xf32> to vector<2x128xf32>
    %436 = arith.addf %434, %435 : vector<2x128xf32>
    %c3_132 = arith.constant 3 : index
    %c0_133 = arith.constant 0 : index
    %c0_134 = arith.constant 0 : index
    %437 = vector.load %arg13[%c3_132, %c0_133, %c0_134] : memref<8x2x128xf32, #tpu.memory_space<vmem>>, vector<1x2x128xf32>
    %438 = vector.shape_cast %437 : vector<1x2x128xf32> to vector<2x128xf32>
    %439 = vector.shape_cast %436 : vector<2x128xf32> to vector<1x2x128xf32>
    tpu.vector_store %arg13[%c3_132, %c0_133, %c0_134], %439 {strides = array<i32>} : memref<8x2x128xf32, #tpu.memory_space<vmem>>, vector<1x2x128xf32>,
    %440 = math.tanh %345 : vector<2x64xf32>
    %c4_135 = arith.constant 4 : index
    %c0_136 = arith.constant 0 : index
    %c0_137 = arith.constant 0 : index
    %441 = vector.load %arg12[%c4_135, %c0_136, %c0_137] : memref<8x2x64xf32, #tpu.memory_space<vmem>>, vector<1x2x64xf32>
    %442 = vector.shape_cast %441 : vector<1x2x64xf32> to vector<2x64xf32>
    %443 = arith.mulf %440, %442 : vector<2x64xf32>
    %cst_138 = arith.constant dense<0.000000e+00> : vector<2x128xf32>
    %444 = tpu.matmul %443, %6, %cst_138 {dimension_numbers = #tpu.dot_dimension_numbers<[1], [0], [0], [1], [0, 0, 1, 1], [], []>} : vector<2x64xf32>, vector<64x128xf32>, vector<2x128xf32> -> vector<2x128xf32>
    %445 = vector.broadcast %7 : vector<1x128xf32> to vector<2x128xf32>
    %446 = arith.addf %444, %445 : vector<2x128xf32>
    %c4_139 = arith.constant 4 : index
    %c0_140 = arith.constant 0 : index
    %c0_141 = arith.constant 0 : index
    %447 = vector.load %arg13[%c4_139, %c0_140, %c0_141] : memref<8x2x128xf32, #tpu.memory_space<vmem>>, vector<1x2x128xf32>
    %448 = vector.shape_cast %447 : vector<1x2x128xf32> to vector<2x128xf32>
    %449 = vector.shape_cast %446 : vector<2x128xf32> to vector<1x2x128xf32>
    tpu.vector_store %arg13[%c4_139, %c0_140, %c0_141], %449 {strides = array<i32>} : memref<8x2x128xf32, #tpu.memory_space<vmem>>, vector<1x2x128xf32>,
    %450 = math.tanh %363 : vector<2x64xf32>
    %c5_142 = arith.constant 5 : index
    %c0_143 = arith.constant 0 : index
    %c0_144 = arith.constant 0 : index
    %451 = vector.load %arg12[%c5_142, %c0_143, %c0_144] : memref<8x2x64xf32, #tpu.memory_space<vmem>>, vector<1x2x64xf32>
    %452 = vector.shape_cast %451 : vector<1x2x64xf32> to vector<2x64xf32>
    %453 = arith.mulf %450, %452 : vector<2x64xf32>
    %cst_145 = arith.constant dense<0.000000e+00> : vector<2x128xf32>
    %454 = tpu.matmul %453, %6, %cst_145 {dimension_numbers = #tpu.dot_dimension_numbers<[1], [0], [0], [1], [0, 0, 1, 1], [], []>} : vector<2x64xf32>, vector<64x128xf32>, vector<2x128xf32> -> vector<2x128xf32>
    %455 = vector.broadcast %7 : vector<1x128xf32> to vector<2x128xf32>
    %456 = arith.addf %454, %455 : vector<2x128xf32>
    %c5_146 = arith.constant 5 : index
    %c0_147 = arith.constant 0 : index
    %c0_148 = arith.constant 0 : index
    %457 = vector.load %arg13[%c5_146, %c0_147, %c0_148] : memref<8x2x128xf32, #tpu.memory_space<vmem>>, vector<1x2x128xf32>
    %458 = vector.shape_cast %457 : vector<1x2x128xf32> to vector<2x128xf32>
    %459 = vector.shape_cast %456 : vector<2x128xf32> to vector<1x2x128xf32>
    tpu.vector_store %arg13[%c5_146, %c0_147, %c0_148], %459 {strides = array<i32>} : memref<8x2x128xf32, #tpu.memory_space<vmem>>, vector<1x2x128xf32>,
    %460 = math.tanh %381 : vector<2x64xf32>
    %c6_149 = arith.constant 6 : index
    %c0_150 = arith.constant 0 : index
    %c0_151 = arith.constant 0 : index
    %461 = vector.load %arg12[%c6_149, %c0_150, %c0_151] : memref<8x2x64xf32, #tpu.memory_space<vmem>>, vector<1x2x64xf32>
    %462 = vector.shape_cast %461 : vector<1x2x64xf32> to vector<2x64xf32>
    %463 = arith.mulf %460, %462 : vector<2x64xf32>
    %cst_152 = arith.constant dense<0.000000e+00> : vector<2x128xf32>
    %464 = tpu.matmul %463, %6, %cst_152 {dimension_numbers = #tpu.dot_dimension_numbers<[1], [0], [0], [1], [0, 0, 1, 1], [], []>} : vector<2x64xf32>, vector<64x128xf32>, vector<2x128xf32> -> vector<2x128xf32>
    %465 = vector.broadcast %7 : vector<1x128xf32> to vector<2x128xf32>
    %466 = arith.addf %464, %465 : vector<2x128xf32>
    %c6_153 = arith.constant 6 : index
    %c0_154 = arith.constant 0 : index
    %c0_155 = arith.constant 0 : index
    %467 = vector.load %arg13[%c6_153, %c0_154, %c0_155] : memref<8x2x128xf32, #tpu.memory_space<vmem>>, vector<1x2x128xf32>
    %468 = vector.shape_cast %467 : vector<1x2x128xf32> to vector<2x128xf32>
    %469 = vector.shape_cast %466 : vector<2x128xf32> to vector<1x2x128xf32>
    tpu.vector_store %arg13[%c6_153, %c0_154, %c0_155], %469 {strides = array<i32>} : memref<8x2x128xf32, #tpu.memory_space<vmem>>, vector<1x2x128xf32>,
    %470 = math.tanh %399 : vector<2x64xf32>
    %c7_156 = arith.constant 7 : index
    %c0_157 = arith.constant 0 : index
    %c0_158 = arith.constant 0 : index
    %471 = vector.load %arg12[%c7_156, %c0_157, %c0_158] : memref<8x2x64xf32, #tpu.memory_space<vmem>>, vector<1x2x64xf32>
    %472 = vector.shape_cast %471 : vector<1x2x64xf32> to vector<2x64xf32>
    %473 = arith.mulf %470, %472 : vector<2x64xf32>
    %cst_159 = arith.constant dense<0.000000e+00> : vector<2x128xf32>
    %474 = tpu.matmul %473, %6, %cst_159 {dimension_numbers = #tpu.dot_dimension_numbers<[1], [0], [0], [1], [0, 0, 1, 1], [], []>} : vector<2x64xf32>, vector<64x128xf32>, vector<2x128xf32> -> vector<2x128xf32>
    %475 = vector.broadcast %7 : vector<1x128xf32> to vector<2x128xf32>
    %476 = arith.addf %474, %475 : vector<2x128xf32>
    %c7_160 = arith.constant 7 : index
    %c0_161 = arith.constant 0 : index
    %c0_162 = arith.constant 0 : index
    %477 = vector.load %arg13[%c7_160, %c0_161, %c0_162] : memref<8x2x128xf32, #tpu.memory_space<vmem>>, vector<1x2x128xf32>
    %478 = vector.shape_cast %477 : vector<1x2x128xf32> to vector<2x128xf32>
    %479 = vector.shape_cast %476 : vector<2x128xf32> to vector<1x2x128xf32>
    tpu.vector_store %arg13[%c7_160, %c0_161, %c0_162], %479 {strides = array<i32>} : memref<8x2x128xf32, #tpu.memory_space<vmem>>, vector<1x2x128xf32>,
    return
  }
}

</mosaic_0001>

<bundles_post_ra>
// kernel: tpu_custom_call.1
= control target key start
LH: loop header
LB: loop body
LE: loop exit
PB: predicated region body
PF: predicated region fallthrough
CT: control target
= control target key end

     0   :  { %18 = vsyncpa [#allocation3], 0  ;;  %s6192_s0 = inlined_call_operand.hbm [shape: f32[8,2,16], index: 0, kind: input, shape index: {}]   ;;  %s6193_s1 = inlined_call_operand.vmem [shape: f32[2,64], index: 1, kind: input, shape index: {}]   ;;  %s6194_s2 = inlined_call_operand.hbm [shape: f32[2,64], index: 2, kind: input, shape index: {}]   ;;  %s6195_s3 = inlined_call_operand.hbm [shape: f32[16,256], index: 3, kind: input, shape index: {}]   ;;  %s6196_s4 = inlined_call_operand.hbm [shape: f32[64,256], index: 4, kind: input, shape index: {}]   ;;  %s6197_s5 = inlined_call_operand.hbm [shape: f32[1,256], index: 5, kind: input, shape index: {}]   ;;  %s6198_s6 = inlined_call_operand.hbm [shape: f32[64,256], index: 6, kind: input, shape index: {}]   ;;  %s6199_s7 = inlined_call_operand.hbm [shape: f32[64,256], index: 7, kind: input, shape index: {}]   ;;  %s6200_s8 = inlined_call_operand.hbm [shape: f32[1,256], index: 8, kind: input, shape index: {}]   ;;  %s6201_s9 = inlined_call_operand.hbm [shape: f32[64,128], index: 9, kind: input, shape index: {}]   ;;  %s6202_s10 = inlined_call_operand.vmem [shape: f32[1,128], index: 10, kind: input, shape index: {}]   ;;  %s6203_s11 = inlined_call_operand.vmem [shape: f32[8,2,64], index: 11, kind: input, shape index: {}]   ;;  %s6204_s12 = inlined_call_operand.vmem [shape: f32[8,2,64], index: 12, kind: input, shape index: {}]   ;;  %s6205_s13 = inlined_call_operand.hbm [shape: f32[8,2,128], index: 13, kind: output, shape index: {}]  }
   0x1   :  { %19 = vsyncpa [#allocation6], 0 }
   0x2   :  { %20 = vsyncpa [#allocation9], 0 }
   0x3   :  { %21 = vsyncpa [#allocation12], 0 }
   0x4   :  { %22 = vsyncpa [#allocation15], 0 }
   0x5   :  { %23 = vsyncpa [#allocation4], 0  ;;  %s5255_s25 = smov [#allocation5]   ;;  %s5023_s29 = scalar_lea.hbm %s6194_s2, 32 }
   0x6   :  { %s44_s26 = sshll.u32 %s5255_s25, 4  ;;  %p5024_p0 = scmp.ne.s32.totalorder %s6194_s2, %s5023_s29  ;;  %s45_s26 = int_to_ptr.vmem [resolvable:$true] %s44_s26 }
   0x7   :  { %p5027_p1 = scmp.lt.u32.totalorder %s5023_s29, %s6194_s2 }
   0x9   :  { %p5029_p2 = pnand %p5027_p1, %p5024_p0 }
   0xb   :  { %5032 = shalt.err (!%p5029_p2)
}
   0xc   :  { %s5033_s17 = scalar_lea.vmem %s45_s26, 32  ;;  %p5038_p4 = scmp.lt.s32.totalorder %s45_s26, %s45_s26 }
   0xd   :  { %p5034_p3 = scmp.ne.s32.totalorder %s45_s26, %s5033_s17  ;;  %p5039_p5 = scmp.lt.s32.totalorder %s5033_s17, %s5033_s17 }
   0xf   :  { %p5040_p6 = por %p5039_p5, %p5038_p4 }
  0x11   :  { %p5041_p7 = pnand %p5040_p6, %p5034_p3 }
  0x13   :  { %5044 = shalt.err (!%p5041_p7)
}
  0x14   :  { %47 = dma.hbm_to_vmem [thread:$0]  %s6194_s2, 32, %s45_s26, [#allocation6]  }
  0x15   :  { %s5256_s20 = smov [#allocation8]   ;;  %s5257_s22 = smov [#allocation11]  }
  0x16   :  { %s65_s21 = sshll.u32 %s5256_s20, 4  ;;  %s87_s23 = sshll.u32 %s5257_s22, 4  ;;  %s66_s21 = int_to_ptr.vmem [resolvable:$true] %s65_s21  ;;  %s88_s23 = int_to_ptr.vmem [resolvable:$true] %s87_s23 }
  0x17   :  { %s5045_s27 = scalar_lea.hbm %s6196_s4, 2048 }
  0x18   :  { %p5046_p8 = scmp.ne.s32.totalorder %s6196_s4, %s5045_s27  ;;  %p5049_p9 = scmp.lt.u32.totalorder %s5045_s27, %s6196_s4 }
  0x1a   :  { %p5051_p10 = pnand %p5049_p9, %p5046_p8 }
  0x1c   :  { %5054 = shalt.err (!%p5051_p10)
}
  0x1d   :  { %s5055_s2 = scalar_lea.vmem %s66_s21, 2048  ;;  %p5060_p12 = scmp.lt.s32.totalorder %s66_s21, %s66_s21 }
  0x1e   :  { %p5056_p11 = scmp.ne.s32.totalorder %s66_s21, %s5055_s2  ;;  %p5061_p13 = scmp.lt.s32.totalorder %s5055_s2, %s5055_s2 }
  0x20   :  { %p5062_p0 = por %p5061_p13, %p5060_p12 }
  0x22   :  { %p5063_p1 = pnand %p5062_p0, %p5056_p11 }
  0x24   :  { %5066 = shalt.err (!%p5063_p1)
}
  0x25   :  { %s5258_s26 = smov 256   ;;  %s5259_s15 = smov 16  }
  0x26   :  { %71 = dma.hbm_to_vmem [thread:$0]  %s6196_s4, 2048, %s66_s21, [#allocation9], %s5258_s26, %s5258_s26, %s5259_s15  }
  0x27   :  { %s5067_s20 = scalar_lea.hbm %s6198_s6, 2048 }
  0x28   :  { %p5068_p2 = scmp.ne.s32.totalorder %s6198_s6, %s5067_s20  ;;  %p5071_p3 = scmp.lt.u32.totalorder %s5067_s20, %s6198_s6 }
  0x2a   :  { %p5073_p4 = pnand %p5071_p3, %p5068_p2 }
  0x2c   :  { %5076 = shalt.err (!%p5073_p4)
}
  0x2d   :  { %s5077_s28 = scalar_lea.vmem %s88_s23, 2048  ;;  %p5082_p6 = scmp.lt.s32.totalorder %s88_s23, %s88_s23 }
  0x2e   :  { %p5078_p5 = scmp.ne.s32.totalorder %s88_s23, %s5077_s28  ;;  %p5083_p7 = scmp.lt.s32.totalorder %s5077_s28, %s5077_s28 }
  0x30   :  { %p5084_p8 = por %p5083_p7, %p5082_p6 }
  0x32   :  { %p5085_p9 = pnand %p5084_p8, %p5078_p5 }
  0x34   :  { %5088 = shalt.err (!%p5085_p9)
}
  0x35   :  { %93 = dma.hbm_to_vmem [thread:$0]  %s6198_s6, 2048, %s88_s23, [#allocation12], %s5258_s26, %s5258_s26, %s5259_s15  }
  0x36   :  { %s5260_s29 = smov [#allocation14]   ;;  %s5261_s14 = smov [#allocation2]  }
  0x37   :  { %s112_s30 = sshll.u32 %s5260_s29, 4  ;;  %s29_s2 = sshll.u32 %s5261_s14, 4  ;;  %s113_s30 = int_to_ptr.vmem [resolvable:$true] %s112_s30  ;;  %s30_s2 = int_to_ptr.vmem [resolvable:$true] %s29_s2 }
  0x38   :  { %s5089_s18 = scalar_lea.hbm %s6200_s8, 32 }
  0x39   :  { %p5090_p10 = scmp.ne.s32.totalorder %s6200_s8, %s5089_s18  ;;  %p5093_p11 = scmp.lt.u32.totalorder %s5089_s18, %s6200_s8 }
  0x3b   :  { %p5095_p12 = pnand %p5093_p11, %p5090_p10 }
  0x3d   :  { %5098 = shalt.err (!%p5095_p12)
}
  0x3e   :  { %s5099_s6 = scalar_lea.vmem %s113_s30, 32  ;;  %p5104_p0 = scmp.lt.s32.totalorder %s113_s30, %s113_s30 }
  0x3f   :  { %p5100_p13 = scmp.ne.s32.totalorder %s113_s30, %s5099_s6  ;;  %p5105_p1 = scmp.lt.s32.totalorder %s5099_s6, %s5099_s6 }
  0x41   :  { %p5106_p2 = por %p5105_p1, %p5104_p0 }
  0x43   :  { %p5107_p3 = pnand %p5106_p2, %p5100_p13 }
  0x45   :  { %5110 = shalt.err (!%p5107_p3)
}
  0x46   :  { %115 = dma.hbm_to_vmem [thread:$0]  %s6200_s8, 32, %s113_s30, [#allocation15]  }
  0x47   :  { %s5111_s4 = scalar_lea.hbm %s6192_s0, 256 }
  0x48   :  { %p5112_p4 = scmp.ne.s32.totalorder %s6192_s0, %s5111_s4  ;;  %p5115_p5 = scmp.lt.u32.totalorder %s5111_s4, %s6192_s0 }
  0x4a   :  { %p5117_p6 = pnand %p5115_p5, %p5112_p4 }
  0x4c   :  { %5120 = shalt.err (!%p5117_p6)
}
  0x4d   :  { %s5121_s17 = scalar_lea.vmem %s30_s2, 256  ;;  %p5126_p8 = scmp.lt.s32.totalorder %s30_s2, %s30_s2 }
  0x4e   :  { %p5122_p7 = scmp.ne.s32.totalorder %s30_s2, %s5121_s17  ;;  %p5127_p9 = scmp.lt.s32.totalorder %s5121_s17, %s5121_s17 }
  0x50   :  { %p5128_p10 = por %p5127_p9, %p5126_p8 }
  0x52   :  { %p5129_p11 = pnand %p5128_p10, %p5122_p7 }
  0x54   :  { %5132 = shalt.err (!%p5129_p11)
}
  0x55   :  { %s5262_s8 = smov 32   ;;  %s5263_s30 = smov 2  }
  0x56   :  { %35 = dma.hbm_to_vmem [thread:$0]  %s6192_s0, 256, %s30_s2, [#allocation3], %s5262_s8, %s5262_s8, %s5263_s30  }
  0x57   :  { %s5264_s20 = smov [#allocation7]   ;;  %s5265_s24 = smov [#allocation10]  }
  0x58   :  { %s53_s22 = sshll.u32 %s5264_s20, 4  ;;  %s78_s6 = sshll.u32 %s5265_s24, 4  ;;  %s54_s22 = int_to_ptr.vmem [resolvable:$true] %s53_s22  ;;  %s79_s6 = int_to_ptr.vmem [resolvable:$true] %s78_s6 }
  0x59   :  { %s5133_s27 = scalar_lea.hbm %s6195_s3, 512 }
  0x5a   :  { %p5134_p12 = scmp.ne.s32.totalorder %s6195_s3, %s5133_s27  ;;  %p5137_p13 = scmp.lt.u32.totalorder %s5133_s27, %s6195_s3 }
  0x5c   :  { %p5139_p0 = pnand %p5137_p13, %p5134_p12 }
  0x5e   :  { %5142 = shalt.err (!%p5139_p0)
}
  0x5f   :  { %s5143_s0 = scalar_lea.vmem %s54_s22, 512  ;;  %p5148_p2 = scmp.lt.s32.totalorder %s54_s22, %s54_s22 }
  0x60   :  { %p5144_p1 = scmp.ne.s32.totalorder %s54_s22, %s5143_s0  ;;  %p5149_p3 = scmp.lt.s32.totalorder %s5143_s0, %s5143_s0 }
  0x62   :  { %p5150_p4 = por %p5149_p3, %p5148_p2 }
  0x64   :  { %p5151_p5 = pnand %p5150_p4, %p5144_p1 }
  0x66   :  { %5154 = shalt.err (!%p5151_p5)
}
  0x67   :  { %59 = dma.hbm_to_vmem [thread:$0]  %s6195_s3, 512, %s54_s22, [#allocation6], %s5258_s26, %s5258_s26, %s5259_s15  }
  0x68   :  { %s5155_s18 = scalar_lea.hbm %s6197_s5, 32 }
  0x69   :  { %p5156_p6 = scmp.ne.s32.totalorder %s6197_s5, %s5155_s18  ;;  %p5159_p7 = scmp.lt.u32.totalorder %s5155_s18, %s6197_s5 }
  0x6b   :  { %p5161_p8 = pnand %p5159_p7, %p5156_p6 }
  0x6d   :  { %5164 = shalt.err (!%p5161_p8)
}
  0x6e   :  { %s5165_s25 = scalar_lea.vmem %s79_s6, 32  ;;  %p5170_p10 = scmp.lt.s32.totalorder %s79_s6, %s79_s6 }
  0x6f   :  { %p5166_p9 = scmp.ne.s32.totalorder %s79_s6, %s5165_s25  ;;  %p5171_p11 = scmp.lt.s32.totalorder %s5165_s25, %s5165_s25 }
  0x71   :  { %p5172_p12 = por %p5171_p11, %p5170_p10 }
  0x73   :  { %p5173_p13 = pnand %p5172_p12, %p5166_p9 }
  0x75   :  { %5176 = shalt.err (!%p5173_p13)
}
  0x76   :  { %81 = dma.hbm_to_vmem [thread:$0]  %s6197_s5, 32, %s79_s6, [#allocation9]  }
  0x77   :  { %s5266_s27 = smov [#allocation13]   ;;  %s5267_s4 = smov [#allocation16]  }
  0x78   :  { %s99_s28 = sshll.u32 %s5266_s27, 4  ;;  %s121_s21 = sshll.u32 %s5267_s4, 4  ;;  %s100_s28 = int_to_ptr.vmem [resolvable:$true] %s99_s28  ;;  %s122_s21 = int_to_ptr.vmem [resolvable:$true] %s121_s21 }
  0x79   :  { %s5177_s2 = scalar_lea.hbm %s6199_s7, 2048 }
  0x7a   :  { %p5178_p0 = scmp.ne.s32.totalorder %s6199_s7, %s5177_s2  ;;  %p5181_p1 = scmp.lt.u32.totalorder %s5177_s2, %s6199_s7 }
  0x7c   :  { %p5183_p2 = pnand %p5181_p1, %p5178_p0 }
  0x7e   :  { %5186 = shalt.err (!%p5183_p2)
}
  0x7f   :  { %s5187_s5 = scalar_lea.vmem %s100_s28, 2048  ;;  %p5192_p4 = scmp.lt.s32.totalorder %s100_s28, %s100_s28 }
  0x80   :  { %p5188_p3 = scmp.ne.s32.totalorder %s100_s28, %s5187_s5  ;;  %p5193_p5 = scmp.lt.s32.totalorder %s5187_s5, %s5187_s5 }
  0x82   :  { %p5194_p6 = por %p5193_p5, %p5192_p4 }
  0x84   :  { %p5195_p7 = pnand %p5194_p6, %p5188_p3 }
  0x86   :  { %5198 = shalt.err (!%p5195_p7)
}
  0x87   :  { %105 = dma.hbm_to_vmem [thread:$0]  %s6199_s7, 2048, %s100_s28, [#allocation12], %s5258_s26, %s5258_s26, %s5259_s15  }
  0x88   :  { %s5199_s23 = scalar_lea.hbm %s6201_s9, 1024 }
  0x89   :  { %p5200_p8 = scmp.ne.s32.totalorder %s6201_s9, %s5199_s23  ;;  %p5203_p9 = scmp.lt.u32.totalorder %s5199_s23, %s6201_s9 }
  0x8b   :  { %p5205_p10 = pnand %p5203_p9, %p5200_p8 }
  0x8d   :  { %5208 = shalt.err (!%p5205_p10)
}
  0x8e   :  { %s5209_s4 = scalar_lea.vmem %s122_s21, 1024  ;;  %p5214_p12 = scmp.lt.s32.totalorder %s122_s21, %s122_s21 }
  0x8f   :  { %p5210_p11 = scmp.ne.s32.totalorder %s122_s21, %s5209_s4  ;;  %p5215_p13 = scmp.lt.s32.totalorder %s5209_s4, %s5209_s4 }
  0x91   :  { %p5216_p0 = por %p5215_p13, %p5214_p12 }
  0x93   :  { %p5217_p1 = pnand %p5216_p0, %p5210_p11 }
  0x95   :  { %5220 = shalt.err (!%p5217_p1)
}
  0x96   :  { %s5268_s7 = smov 128   ;;  %s5269_s26 = smov 8  }
  0x97   :  { %127 = dma.hbm_to_vmem [thread:$0]  %s6201_s9, 1024, %s122_s21, [#allocation15], %s5268_s7, %s5268_s7, %s5269_s26  }
  0x98   :  { %5243 = dma.done.wait [#allocation3], 256  }
  0x99   :  { %5244 = vsyncadd [#allocation3], 4294967040 }
  0x9a   :  { %5245 = dma.done.wait [#allocation6], 544  }
  0x9b   :  { %5246 = vsyncadd [#allocation6], 4294966752 }
  0x9c   :  { %5247 = dma.done.wait [#allocation9], 2080  }
  0x9d   :  { %5248 = vsyncadd [#allocation9], 4294965216 }
  0x9e   :  { %5249 = dma.done.wait [#allocation12], 4096  }
  0x9f   :  { %5250 = vsyncadd [#allocation12], 4294963200 }
  0xa0   :  { %5251 = dma.done.wait [#allocation15], 1056  }
  0xa1   :  { %5252 = vsyncadd [#allocation15], 4294966240  ;;  %v5270_v0 = vmov 0.0   ;;  %v162_v1 = vld [vmem:[#allocation7 + $0x8] sm:$0xff]  ;;  %v164_v2 = vld [vmem:[#allocation7 + $0x18] sm:$0xff]  ;;  %vm245_vm0 = vcmask 130048   ;;  %v224_v37 = vlaneseq }
  0xa2   :  { %313 = vmatprep.mubr.f32.mxu0 %v5270_v0  ;;  %389 = vmatprep.mubr.f32.mxu1 %v5270_v0  ;;  %v161_v3 = vld [vmem:[#allocation7] sm:$0xff]  ;;  %v5470_v4 = vpack.c.bf16 %v164_v2, %v162_v1  ;;  %v163_v5 = vld [vmem:[#allocation7 + $0x10] sm:$0xff]  ;;  %v233_v7 = vld [vmem:[#allocation2] sm:$0x3]  ;;  %s5271_s9 = smov 64   ;;  %vm854_vm1 = vcmask 523264  }
  0xa3   :  { %v5472_v6 = vpack.c.bf16 %v163_v5, %v161_v3  ;;  %v397_v8 = vld [vmem:[#allocation2 + $0x4] sm:$0x3]  ;;  %v853_v9 = vld [vmem:[#allocation5] sm:$0x3]  ;;  %v166_v10 = vld [vmem:[#allocation8 + $0x8] sm:$0xff]  ;;  %v5532_v38 = vshrl.u32 %v224_v37, 7 }
  0xa4   :  { %4204 = vmatprep.subr.bf16.mxu0 %v5470_v4  ;;  %4208 = vmatprep.subr.bf16.mxu1 %v5470_v4  ;;  %v168_v11 = vld [vmem:[#allocation8 + $0x18] sm:$0xff]  ;;  %v549_v12 = vld [vmem:[#allocation2 + $0x8] sm:$0x3]  ;;  %v165_v14 = vld [vmem:[#allocation8] sm:$0xff]  ;;  %v225_v54 = vand.u32 127, %v224_v37  ;;  %vm5273_vm3 = vmmov 0  }
  0xa5   :  { %4206 = vmatpush1.bf16.msra.mxu0 %v5472_v6  ;;  %4210 = vmatpush1.bf16.msra.mxu1 %v5472_v6  ;;  %v5489_v13 = vpack.c.bf16 %v168_v11, %v166_v10  ;;  %v167_v15 = vld [vmem:[#allocation8 + $0x10] sm:$0xff]  ;;  %v170_v16 = vld [vmem:[#allocation8 + $0x28] sm:$0xff]  ;;  %v172_v17 = vld [vmem:[#allocation8 + $0x38] sm:$0xff]  ;;  %v237_v39 = vsub.s32 0, %v5532_v38  ;;  %v241_v41 = vsub.s32 1, %v5532_v38 }
  0xa6   :  { %4212 = vmatprep.subr.bf16.mxu0 %v5470_v4  ;;  %4216 = vmatprep.subr.bf16.mxu1 %v5470_v4  ;;  %v701_v18 = vld [vmem:[#allocation2 + $0xc] sm:$0x3]  ;;  %v5494_v19 = vpack.c.bf16 %v167_v15, %v165_v14  ;;  %v5497_v20 = vpack.c.bf16 %v172_v17, %v170_v16  ;;  %v169_v21 = vld [vmem:[#allocation8 + $0x20] sm:$0xff]  ;;  %v171_v22 = vld [vmem:[#allocation8 + $0x30] sm:$0xff]  ;;  %v5546_v55 = vadd.s32 128, %v225_v54 }
  0xa7   :  { %948 = vrot.lane.b32.xlu0 %v853_v9, %s5271_s9  ;;  %v174_v23 = vld [vmem:[#allocation8 + $0x48] sm:$0xff]  ;;  %v176_v24 = vld [vmem:[#allocation8 + $0x58] sm:$0xff]  ;;  %v5501_v25 = vpack.c.bf16 %v171_v22, %v169_v21  ;;  %v173_v27 = vld [vmem:[#allocation8 + $0x40] sm:$0xff] }
  0xa8   :  { %3892 = vmatmul.mubr.msk.f32.vlgmr.msra.gmra.mrb[0].mxu0 %vm245_vm0, %v233_v7  ;;  %v5505_v26 = vpack.c.bf16 %v176_v24, %v174_v23  ;;  %v175_v28 = vld [vmem:[#allocation8 + $0x50] sm:$0xff]  ;;  %v178_v29 = vld [vmem:[#allocation8 + $0x68] sm:$0xff]  ;;  %v180_v30 = vld [vmem:[#allocation8 + $0x78] sm:$0xff]  ;;  %vm230_vm2 = vcmp.lt.s32.totalorder %v5546_v55, 192 }
  0xa9   :  { %4214 = vmatpush1.bf16.msra.mxu0 %v5472_v6  ;;  %465 = vmatprep.mubr.f32.mxu0 %v5270_v0  ;;  %v5508_v31 = vpack.c.bf16 %v175_v28, %v173_v27  ;;  %v5511_v32 = vpack.c.bf16 %v180_v30, %v178_v29  ;;  %v177_v33 = vld [vmem:[#allocation8 + $0x60] sm:$0xff]  ;;  %v179_v34 = vld [vmem:[#allocation8 + $0x70] sm:$0xff]  ;;  %v852_v36 = vld [vmem:[%s6193_s1] sm:$0x3] }
  0xaa   :  { %4220 = vmatprep.subr.bf16.mxu0 %v5470_v4  ;;  %v5514_v35 = vpack.c.bf16 %v179_v34, %v177_v33  ;;  %v181_v40 = vld [vmem:[#allocation10] sm:$0x3]  ;;  %v321_v61 = vld [vmem:[#allocation2 + $0x2] sm:$0x3]  ;;  %v473_v62 = vld [vmem:[#allocation2 + $0x6] sm:$0x3] }
  0xab   :  { %v5538_v42 = vrot.slane %v181_v40, %v237_v39  ;;  %v5542_v43 = vrot.slane %v181_v40, %v241_v41  ;;  %3893 = vmatmul.mubr.msk.f32.vlgmr.msra.gmra.mrb[0].mxu1 %vm245_vm0, %v321_v61  ;;  %v625_v63 = vld [vmem:[#allocation2 + $0xa] sm:$0x3]  ;;  %v777_v1 = vld [vmem:[#allocation2 + $0xe] sm:$0x3] }
  0xac   :  { %3894 = vmatmul.mubr.msk.f32.vlgmr.msra.gmra.mrb[2].mxu0 %vm245_vm0, %v397_v8  ;;  %4218 = vmatpush1.bf16.msra.mxu1 %v5472_v6 }
  0xad   :  { %4222 = vmatpush1.bf16.msra.mxu0 %v5472_v6  ;;  %617 = vmatprep.mubr.f32.mxu0 %v5270_v0 }
  0xae   :  { %4228 = vmatprep.subr.bf16.mxu0 %v5470_v4  ;;  %541 = vmatprep.mubr.f32.mxu1 %v5270_v0 }
  0xaf   :  { %4224 = vmatprep.subr.bf16.mxu1 %v5470_v4  ;;  %3895 = vmatmul.mubr.msk.f32.vlgmr.msra.gmra.mrb[2].mxu1 %vm245_vm0, %v473_v62 }
  0xb0   :  { %3896 = vmatmul.mubr.msk.f32.vlgmr.msra.gmra.mrb[4].mxu0 %vm245_vm0, %v549_v12  ;;  %4226 = vmatpush1.bf16.msra.mxu1 %v5472_v6 }
  0xb1   :  { %4230 = vmatpush1.bf16.msra.mxu0 %v5472_v6  ;;  %769 = vmatprep.mubr.f32.mxu0 %v5270_v0 }
  0xb2   :  { %4236 = vmatprep.subr.bf16.mxu0 %v5489_v13  ;;  %693 = vmatprep.mubr.f32.mxu1 %v5270_v0 }
  0xb3   :  { %4232 = vmatprep.subr.bf16.mxu1 %v5470_v4  ;;  %3897 = vmatmul.mubr.msk.f32.vlgmr.msra.gmra.mrb[4].mxu1 %vm245_vm0, %v625_v63 }
  0xb4   :  { %3898 = vmatmul.mubr.msk.f32.vlgmr.msra.gmra.mrb[6].mxu0 %vm245_vm0, %v701_v18  ;;  %4234 = vmatpush1.bf16.msra.mxu1 %v5472_v6 }
  0xb5   :  { %4238 = vmatpush1.bf16.msra.mxu0 %v5494_v19  ;;  %922 = vmatprep.mubr.f32.mxu0 %v5270_v0 }
  0xb6   :  { %4240 = vmatprep.subr.bf16.mxu0 %v5497_v20  ;;  %845 = vmatprep.mubr.f32.mxu1 %v5270_v0 }
  0xb7   :  { %4252 = vmatprep.subr.bf16.mxu1 %v5489_v13  ;;  %3899 = vmatmul.mubr.msk.f32.vlgmr.msra.gmra.mrb[6].mxu1 %vm245_vm0, %v777_v1 }
  0xb8   :  { %4254 = vmatpush1.bf16.msra.mxu1 %v5494_v19  ;;  %1029 = vmatprep.mubr.f32.mxu1 %v5270_v0 }
  0xb9   :  { %4242 = vmatpush1.bf16.msra.mxu0 %v5501_v25  ;;  %4256 = vmatprep.subr.bf16.mxu1 %v5497_v20 }
  0xba   :  { %4244 = vmatprep.subr.bf16.mxu0 %v5505_v26 }
  0xbc   :  { %4258 = vmatpush1.bf16.msra.mxu1 %v5501_v25 }
  0xbd   :  { %4246 = vmatpush1.bf16.msra.mxu0 %v5508_v31  ;;  %4260 = vmatprep.subr.bf16.mxu1 %v5505_v26 }
  0xbe   :  { %4248 = vmatprep.subr.bf16.mxu0 %v5511_v32 }
  0xc0   :  { %4262 = vmatpush1.bf16.msra.mxu1 %v5508_v31 }
  0xc1   :  { %4250 = vmatpush1.bf16.msra.mxu0 %v5514_v35  ;;  %4264 = vmatprep.subr.bf16.mxu1 %v5511_v32 }
  0xc2   :  { %4268 = vmatprep.subr.bf16.mxu0 %v5489_v13 }
  0xc4   :  { %3900 = vmatmul.mubr.msk.f32.vlgmr.msra.gmra.mrb[0].mxu0 %vm854_vm1, %v852_v36  ;;  %4266 = vmatpush1.bf16.msra.mxu1 %v5514_v35 }
  0xc5   :  { %4270 = vmatpush1.bf16.msra.mxu0 %v5494_v19  ;;  %1132 = vmatprep.mubr.f32.mxu0 %v5270_v0 }
  0xc6   :  { %4272 = vmatprep.subr.bf16.mxu0 %v5497_v20  ;;  %4284 = vmatprep.subr.bf16.mxu1 %v5489_v13 }
  0xc9   :  { %4274 = vmatpush1.bf16.msra.mxu0 %v5501_v25 }
  0xca   :  { %4276 = vmatprep.subr.bf16.mxu0 %v5505_v26 }
  0xcd   :  { %4278 = vmatpush1.bf16.msra.mxu0 %v5508_v31 }
  0xce   :  { %4280 = vmatprep.subr.bf16.mxu0 %v5511_v32 }
  0xd1   :  { %4282 = vmatpush1.bf16.msra.mxu0 %v5514_v35 }
  0xd2   :  { %4300 = vmatprep.subr.bf16.mxu0 %v5489_v13 }
 0x119   :  { %v949_v2 = vpop.permute.xlu0 %948 }
 0x197   :  { %v924_v44 = vpop.f32.mrb[0].mxu0 }
 0x198   :  { %v4715_v45 = vadd.f32 %v924_v44, %v5538_v42  ;;  %v926_v46 = vpop.f32.mrb[1].mxu0 }
 0x199   :  { %v4716_v47 = vadd.f32 %v926_v46, %v5542_v43 }
 0x19a   :  { %v3901_v48 = vmul.f32 -1.442695, %v4715_v45 }
 0x19b   :  { %v3902_v49 = vmul.f32 -1.442695, %v4716_v47 }
 0x19c   :  { %4799 = vpow2.f32 %v3901_v48 }
 0x19d   :  { %4801 = vpow2.f32 %v3902_v49 }
 0x19e   :  { %4803 = vtanh.f32 %v4716_v47 }
 0x1a6   :  { %v4800_v50 = vpop.eup %4799 }
 0x1a7   :  { %v4802_v51 = vpop.eup %4801  ;;  %v939_v52 = vadd.f32 1.0, %v4800_v50 }
 0x1a8   :  { %v940_v53 = vadd.f32 1.0, %v4802_v51  ;;  %v4804_v56 = vpop.eup %4803 }
 0x1aa   :  { %4805 = vrcp.f32 %v940_v53 }
 0x1ab   :  { %4807 = vrcp.f32 %v939_v52 }
 0x1b4   :  { %v4806_v57 = vpop.eup %4805 }
 0x1b5   :  { %v4808_v58 = vpop.eup %4807  ;;  %v946_v59 = vsel %vm230_vm2, %v4804_v56, %v4806_v57 }
 0x1b6   :  { %v952_v60 = vmul.f32 %v4808_v58, %v946_v59  ;;  %v951_v3 = vmul.f32 %v4808_v58, %v949_v2 }
 0x1b8   :  { %954 = vrot.lane.b32.xlu0 %v952_v60, %s5271_s9 }
 0x22a   :  { %v955_v4 = vpop.permute.xlu0 %954 }
 0x22b   :  { %v957_v5 = vadd.f32 %v955_v4, %v951_v3 }
 0x22d   :  { %4809 = vtanh.f32 %v957_v5 }
 0x237   :  { %v4810_v6 = vpop.eup %4809 }
 0x238   :  { %v5574_v7 = vmul.f32 %v4810_v6, %v946_v59 }
 0x23a   :  { %961 = vrot.lane.b32.xlu1 %v5574_v7, %s5271_s9 }
 0x2ac   :  { %v962_v8 = vpop.permute.xlu1 %961 }
 0x2ad   :  { %3903 = vmatmul.mubr.msk.f32.vlgmr.msra.gmra.mrb[0].mxu1 %vm854_vm1, %v962_v8 }
 0x2ae   :  { %4286 = vmatpush1.bf16.msra.mxu1 %v5494_v19  ;;  %1235 = vmatprep.mubr.f32.mxu1 %v5270_v0 }
 0x2af   :  { %4288 = vmatprep.subr.bf16.mxu1 %v5497_v20 }
 0x2b2   :  { %4290 = vmatpush1.bf16.msra.mxu1 %v5501_v25 }
 0x2b3   :  { %4292 = vmatprep.subr.bf16.mxu1 %v5505_v26 }
 0x2b6   :  { %4294 = vmatpush1.bf16.msra.mxu1 %v5508_v31 }
 0x2b7   :  { %4296 = vmatprep.subr.bf16.mxu1 %v5511_v32 }
 0x2ba   :  { %4298 = vmatpush1.bf16.msra.mxu1 %v5514_v35 }
 0x2bb   :  { %4316 = vmatprep.subr.bf16.mxu1 %v5489_v13 }
 0x380   :  { %v1031_v9 = vpop.f32.mrb[0].mxu1 }
 0x381   :  { %v4717_v10 = vadd.f32 %v1031_v9, %v5538_v42  ;;  %v1033_v11 = vpop.f32.mrb[1].mxu1 }
 0x382   :  { %v4718_v12 = vadd.f32 %v1033_v11, %v5542_v43 }
 0x383   :  { %v3904_v14 = vmul.f32 -1.442695, %v4717_v10 }
 0x384   :  { %v3905_v15 = vmul.f32 -1.442695, %v4718_v12 }
 0x385   :  { %4811 = vpow2.f32 %v3904_v14 }
 0x386   :  { %4813 = vpow2.f32 %v3905_v15 }
 0x387   :  { %4815 = vtanh.f32 %v4718_v12 }
 0x38f   :  { %v4812_v16 = vpop.eup %4811 }
 0x390   :  { %v4814_v17 = vpop.eup %4813  ;;  %v1046_v18 = vadd.f32 1.0, %v4812_v16 }
 0x391   :  { %v1047_v21 = vadd.f32 1.0, %v4814_v17  ;;  %v4816_v22 = vpop.eup %4815 }
 0x393   :  { %4817 = vrcp.f32 %v1047_v21 }
 0x394   :  { %4819 = vrcp.f32 %v1046_v18 }
 0x39d   :  { %v4818_v23 = vpop.eup %4817 }
 0x39e   :  { %v4820_v24 = vpop.eup %4819  ;;  %v1053_v27 = vsel %vm230_vm2, %v4816_v22, %v4818_v23 }
 0x39f   :  { %v1055_v28 = vmul.f32 %v4820_v24, %v1053_v27  ;;  %v1054_v29 = vmul.f32 %v4820_v24, %v957_v5 }
 0x3a1   :  { %1057 = vrot.lane.b32.xlu1 %v1055_v28, %s5271_s9 }
 0x413   :  { %v1058_v30 = vpop.permute.xlu1 %1057 }
 0x414   :  { %v1060_v33 = vadd.f32 %v1058_v30, %v1054_v29 }
 0x416   :  { %4821 = vtanh.f32 %v1060_v33 }
 0x420   :  { %v4822_v34 = vpop.eup %4821 }
 0x421   :  { %v5593_v36 = vmul.f32 %v4822_v34, %v1053_v27 }
 0x423   :  { %1064 = vrot.lane.b32.xlu0 %v5593_v36, %s5271_s9 }
 0x495   :  { %v1065_v37 = vpop.permute.xlu0 %1064 }
 0x496   :  { %3906 = vmatmul.mubr.msk.f32.vlgmr.msra.gmra.mrb[2].mxu0 %vm854_vm1, %v1065_v37 }
 0x497   :  { %4302 = vmatpush1.bf16.msra.mxu0 %v5494_v19  ;;  %1338 = vmatprep.mubr.f32.mxu0 %v5270_v0 }
 0x498   :  { %4304 = vmatprep.subr.bf16.mxu0 %v5497_v20 }
 0x49b   :  { %4306 = vmatpush1.bf16.msra.mxu0 %v5501_v25 }
 0x49c   :  { %4308 = vmatprep.subr.bf16.mxu0 %v5505_v26 }
 0x49f   :  { %4310 = vmatpush1.bf16.msra.mxu0 %v5508_v31 }
 0x4a0   :  { %4312 = vmatprep.subr.bf16.mxu0 %v5511_v32 }
 0x4a3   :  { %4314 = vmatpush1.bf16.msra.mxu0 %v5514_v35 }
 0x4a4   :  { %4332 = vmatprep.subr.bf16.mxu0 %v5489_v13 }
 0x569   :  { %v1134_v40 = vpop.f32.mrb[2].mxu0 }
 0x56a   :  { %v4719_v44 = vadd.f32 %v1134_v40, %v5538_v42  ;;  %v1136_v45 = vpop.f32.mrb[3].mxu0 }
 0x56b   :  { %v4720_v46 = vadd.f32 %v1136_v45, %v5542_v43 }
 0x56c   :  { %v3907_v47 = vmul.f32 -1.442695, %v4719_v44 }
 0x56d   :  { %v3908_v48 = vmul.f32 -1.442695, %v4720_v46 }
 0x56e   :  { %4823 = vpow2.f32 %v3907_v47 }
 0x56f   :  { %4825 = vpow2.f32 %v3908_v48 }
 0x570   :  { %4827 = vtanh.f32 %v4720_v46 }
 0x578   :  { %v4824_v49 = vpop.eup %4823 }
 0x579   :  { %v4826_v50 = vpop.eup %4825  ;;  %v1149_v51 = vadd.f32 1.0, %v4824_v49 }
 0x57a   :  { %v1150_v52 = vadd.f32 1.0, %v4826_v50  ;;  %v4828_v53 = vpop.eup %4827 }
 0x57c   :  { %4829 = vrcp.f32 %v1150_v52 }
 0x57d   :  { %4831 = vrcp.f32 %v1149_v51 }
 0x586   :  { %v4830_v54 = vpop.eup %4829 }
 0x587   :  { %v4832_v56 = vpop.eup %4831  ;;  %v1156_v57 = vsel %vm230_vm2, %v4828_v53, %v4830_v54 }
 0x588   :  { %v1158_v58 = vmul.f32 %v4832_v56, %v1156_v57  ;;  %v1157_v59 = vmul.f32 %v4832_v56, %v1060_v33 }
 0x58a   :  { %1160 = vrot.lane.b32.xlu1 %v1158_v58, %s5271_s9 }
 0x5fc   :  { %v1161_v60 = vpop.permute.xlu1 %1160 }
 0x5fd   :  { %v1163_v61 = vadd.f32 %v1161_v60, %v1157_v59 }
 0x5ff   :  { %4833 = vtanh.f32 %v1163_v61 }
 0x609   :  { %v4834_v62 = vpop.eup %4833 }
 0x60a   :  { %v5612_v63 = vmul.f32 %v4834_v62, %v1156_v57 }
 0x60c   :  { %1167 = vrot.lane.b32.xlu0 %v5612_v63, %s5271_s9 }
 0x67e   :  { %v1168_v1 = vpop.permute.xlu0 %1167 }
 0x67f   :  { %3909 = vmatmul.mubr.msk.f32.vlgmr.msra.gmra.mrb[2].mxu1 %vm854_vm1, %v1168_v1 }
 0x680   :  { %4318 = vmatpush1.bf16.msra.mxu1 %v5494_v19  ;;  %1441 = vmatprep.mubr.f32.mxu1 %v5270_v0 }
 0x681   :  { %4320 = vmatprep.subr.bf16.mxu1 %v5497_v20 }
 0x684   :  { %4322 = vmatpush1.bf16.msra.mxu1 %v5501_v25 }
 0x685   :  { %4324 = vmatprep.subr.bf16.mxu1 %v5505_v26 }
 0x688   :  { %4326 = vmatpush1.bf16.msra.mxu1 %v5508_v31 }
 0x689   :  { %4328 = vmatprep.subr.bf16.mxu1 %v5511_v32 }
 0x68c   :  { %4330 = vmatpush1.bf16.msra.mxu1 %v5514_v35 }
 0x68d   :  { %4348 = vmatprep.subr.bf16.mxu1 %v5489_v13 }
 0x752   :  { %v1237_v2 = vpop.f32.mrb[2].mxu1 }
 0x753   :  { %v4721_v3 = vadd.f32 %v1237_v2, %v5538_v42  ;;  %v1239_v4 = vpop.f32.mrb[3].mxu1 }
 0x754   :  { %v4722_v5 = vadd.f32 %v1239_v4, %v5542_v43 }
 0x755   :  { %v3910_v6 = vmul.f32 -1.442695, %v4721_v3 }
 0x756   :  { %v3911_v8 = vmul.f32 -1.442695, %v4722_v5 }
 0x757   :  { %4835 = vpow2.f32 %v3910_v6 }
 0x758   :  { %4837 = vpow2.f32 %v3911_v8 }
 0x759   :  { %4839 = vtanh.f32 %v4722_v5 }
 0x761   :  { %v4836_v9 = vpop.eup %4835 }
 0x762   :  { %v4838_v10 = vpop.eup %4837  ;;  %v1252_v11 = vadd.f32 1.0, %v4836_v9 }
 0x763   :  { %v1253_v12 = vadd.f32 1.0, %v4838_v10  ;;  %v4840_v14 = vpop.eup %4839 }
 0x765   :  { %4841 = vrcp.f32 %v1253_v12 }
 0x766   :  { %4843 = vrcp.f32 %v1252_v11 }
 0x76f   :  { %v4842_v15 = vpop.eup %4841 }
 0x770   :  { %v4844_v13 = vpop.eup %4843  ;;  %v1259_v16 = vsel %vm230_vm2, %v4840_v14, %v4842_v15 }
 0x771   :  { %v1261_v17 = vmul.f32 %v4844_v13, %v1259_v16  ;;  %v1260_v18 = vmul.f32 %v4844_v13, %v1163_v61 }
 0x773   :  { %1263 = vrot.lane.b32.xlu1 %v1261_v17, %s5271_s9 }
 0x7e5   :  { %v1264_v21 = vpop.permute.xlu1 %1263 }
 0x7e6   :  { %v1266_v22 = vadd.f32 %v1264_v21, %v1260_v18 }
 0x7e8   :  { %4845 = vtanh.f32 %v1266_v22 }
 0x7f2   :  { %v4846_v23 = vpop.eup %4845 }
 0x7f3   :  { %v5631_v24 = vmul.f32 %v4846_v23, %v1259_v16 }
 0x7f5   :  { %1270 = vrot.lane.b32.xlu0 %v5631_v24, %s5271_s9 }
 0x867   :  { %v1271_v27 = vpop.permute.xlu0 %1270 }
 0x868   :  { %3912 = vmatmul.mubr.msk.f32.vlgmr.msra.gmra.mrb[4].mxu0 %vm854_vm1, %v1271_v27 }
 0x869   :  { %4334 = vmatpush1.bf16.msra.mxu0 %v5494_v19  ;;  %1544 = vmatprep.mubr.f32.mxu0 %v5270_v0 }
 0x86a   :  { %4336 = vmatprep.subr.bf16.mxu0 %v5497_v20 }
 0x86d   :  { %4338 = vmatpush1.bf16.msra.mxu0 %v5501_v25 }
 0x86e   :  { %4340 = vmatprep.subr.bf16.mxu0 %v5505_v26 }
 0x871   :  { %4342 = vmatpush1.bf16.msra.mxu0 %v5508_v31 }
 0x872   :  { %4344 = vmatprep.subr.bf16.mxu0 %v5511_v32 }
 0x875   :  { %4346 = vmatpush1.bf16.msra.mxu0 %v5514_v35 }
 0x93b   :  { %v1340_v28 = vpop.f32.mrb[4].mxu0 }
 0x93c   :  { %v4723_v29 = vadd.f32 %v1340_v28, %v5538_v42  ;;  %v1342_v30 = vpop.f32.mrb[5].mxu0 }
 0x93d   :  { %v4724_v33 = vadd.f32 %v1342_v30, %v5542_v43 }
 0x93e   :  { %v3913_v34 = vmul.f32 -1.442695, %v4723_v29 }
 0x93f   :  { %v3914_v37 = vmul.f32 -1.442695, %v4724_v33 }
 0x940   :  { %4847 = vpow2.f32 %v3913_v34  ;;  %v1682_v34 = vld [vmem:[%s6203_s11] sm:$0x3] }
 0x941   :  { %4849 = vpow2.f32 %v3914_v37  ;;  %v3927_v37 = vld [vmem:[%s6203_s11 + $0x8] sm:$0x3] }
 0x942   :  { %4851 = vtanh.f32 %v4724_v33 }
 0x94a   :  { %v4848_v40 = vpop.eup %4847 }
 0x94b   :  { %v4850_v44 = vpop.eup %4849  ;;  %v1355_v45 = vadd.f32 1.0, %v4848_v40  ;;  %v183_v40 = vld [vmem:[#allocation11 + $0x8] sm:$0xff] }
 0x94c   :  { %v1356_v46 = vadd.f32 1.0, %v4850_v44  ;;  %v4852_v47 = vpop.eup %4851  ;;  %v185_v44 = vld [vmem:[#allocation11 + $0x18] sm:$0xff] }
 0x94e   :  { %4853 = vrcp.f32 %v1356_v46  ;;  %v5686_v46 = vpack.c.bf16 %v185_v44, %v183_v40 }
 0x94f   :  { %4855 = vrcp.f32 %v1355_v45  ;;  %v182_v45 = vld [vmem:[#allocation11] sm:$0xff] }
 0x950   :  { %4364 = vmatprep.subr.bf16.mxu0 %v5686_v46 }
 0x958   :  { %v4854_v48 = vpop.eup %4853 }
 0x959   :  { %v4856_v49 = vpop.eup %4855  ;;  %v1362_v50 = vsel %vm230_vm2, %v4852_v47, %v4854_v48  ;;  %v184_v47 = vld [vmem:[#allocation11 + $0x10] sm:$0xff] }
 0x95a   :  { %v1364_v51 = vmul.f32 %v4856_v49, %v1362_v50  ;;  %v1363_v52 = vmul.f32 %v4856_v49, %v1266_v22  ;;  %v5688_v48 = vpack.c.bf16 %v184_v47, %v182_v45 }
 0x95c   :  { %1366 = vrot.lane.b32.xlu1 %v1364_v51, %s5271_s9  ;;  %v187_v51 = vld [vmem:[#allocation11 + $0x28] sm:$0xff] }
 0x9ce   :  { %v1367_v53 = vpop.permute.xlu1 %1366 }
 0x9cf   :  { %v1369_v54 = vadd.f32 %v1367_v53, %v1363_v52  ;;  %v189_v52 = vld [vmem:[#allocation11 + $0x38] sm:$0xff] }
 0x9d1   :  { %4857 = vtanh.f32 %v1369_v54 }
 0x9db   :  { %v4858_v56 = vpop.eup %4857 }
 0x9dc   :  { %v5649_v57 = vmul.f32 %v4858_v56, %v1362_v50  ;;  %v186_v56 = vld [vmem:[#allocation11 + $0x20] sm:$0xff] }
 0x9de   :  { %1373 = vrot.lane.b32.xlu0 %v5649_v57, %s5271_s9 }
 0xa50   :  { %v1374_v58 = vpop.permute.xlu0 %1373 }
 0xa51   :  { %3915 = vmatmul.mubr.msk.f32.vlgmr.msra.gmra.mrb[4].mxu1 %vm854_vm1, %v1374_v58  ;;  %v188_v58 = vld [vmem:[#allocation11 + $0x30] sm:$0xff] }
 0xa52   :  { %4350 = vmatpush1.bf16.msra.mxu1 %v5494_v19  ;;  %1647 = vmatprep.mubr.f32.mxu1 %v5270_v0 }
 0xa53   :  { %4352 = vmatprep.subr.bf16.mxu1 %v5497_v20 }
 0xa56   :  { %4354 = vmatpush1.bf16.msra.mxu1 %v5501_v25 }
 0xa57   :  { %4356 = vmatprep.subr.bf16.mxu1 %v5505_v26 }
 0xa5a   :  { %4358 = vmatpush1.bf16.msra.mxu1 %v5508_v31 }
 0xa5b   :  { %4360 = vmatprep.subr.bf16.mxu1 %v5511_v32 }
 0xa5e   :  { %4362 = vmatpush1.bf16.msra.mxu1 %v5514_v35 }
 0xa5f   :  { %4380 = vmatprep.subr.bf16.mxu1 %v5686_v46 }
 0xb24   :  { %v1443_v59 = vpop.f32.mrb[4].mxu1 }
 0xb25   :  { %v4725_v60 = vadd.f32 %v1443_v59, %v5538_v42  ;;  %v1445_v61 = vpop.f32.mrb[5].mxu1  ;;  %v5697_v59 = vpack.c.bf16 %v188_v58, %v186_v56 }
 0xb26   :  { %v4726_v19 = vadd.f32 %v1445_v61, %v5542_v43  ;;  %v193_v61 = vld [vmem:[#allocation11 + $0x58] sm:$0xff] }
 0xb27   :  { %v3916_v62 = vmul.f32 -1.442695, %v4725_v60  ;;  %v191_v60 = vld [vmem:[#allocation11 + $0x48] sm:$0xff] }
 0xb28   :  { %v3917_v1 = vmul.f32 -1.442695, %v4726_v19 }
 0xb29   :  { %4859 = vpow2.f32 %v3916_v62  ;;  %v190_v62 = vld [vmem:[#allocation11 + $0x40] sm:$0xff] }
 0xb2a   :  { %4861 = vpow2.f32 %v3917_v1  ;;  %v192_v1 = vld [vmem:[#allocation11 + $0x50] sm:$0xff] }
 0xb2b   :  { %4863 = vtanh.f32 %v4726_v19  ;;  %v5702_v19 = vpack.c.bf16 %v193_v61, %v191_v60 }
 0xb33   :  { %v4860_v20 = vpop.eup %4859 }
 0xb34   :  { %v4862_v25 = vpop.eup %4861  ;;  %v1458_v2 = vadd.f32 1.0, %v4860_v20  ;;  %v5704_v20 = vpack.c.bf16 %v192_v1, %v190_v62  ;;  %v3926_v62 = vld [vmem:[%s6203_s11 + $0x6] sm:$0x3] }
 0xb35   :  { %v1459_v26 = vadd.f32 1.0, %v4862_v25  ;;  %v4864_v31 = vpop.eup %4863  ;;  %v195_v25 = vld [vmem:[#allocation11 + $0x68] sm:$0xff] }
 0xb37   :  { %4865 = vrcp.f32 %v1459_v26 }
 0xb38   :  { %4867 = vrcp.f32 %v1458_v2  ;;  %v197_v2 = vld [vmem:[#allocation11 + $0x78] sm:$0xff] }
 0xb39   :  { %v5708_v26 = vpack.c.bf16 %v197_v2, %v195_v25  ;;  %v3930_v25 = vld [vmem:[%s6203_s11 + $0xe] sm:$0x3] }
 0xb41   :  { %v4866_v32 = vpop.eup %4865 }
 0xb42   :  { %v4868_v35 = vpop.eup %4867  ;;  %v1465_v3 = vsel %vm230_vm2, %v4864_v31, %v4866_v32  ;;  %v194_v31 = vld [vmem:[#allocation11 + $0x60] sm:$0xff]  ;;  %v196_v32 = vld [vmem:[#allocation11 + $0x70] sm:$0xff] }
 0xb43   :  { %v1467_v4 = vmul.f32 %v4868_v35, %v1465_v3  ;;  %v1466_v5 = vmul.f32 %v4868_v35, %v1369_v54  ;;  %v5695_v54 = vpack.c.bf16 %v189_v52, %v187_v51  ;;  %v5710_v35 = vpack.c.bf16 %v196_v32, %v194_v31  ;;  %v199_v32 = vld [vmem:[#allocation13 + $0x8] sm:$0xff] }
 0xb45   :  { %1469 = vrot.lane.b32.xlu1 %v1467_v4, %s5271_s9 }
 0xbb7   :  { %v1470_v6 = vpop.permute.xlu1 %1469 }
 0xbb8   :  { %v1472_v8 = vadd.f32 %v1470_v6, %v1466_v5  ;;  %v3925_v5 = vld [vmem:[%s6203_s11 + $0x4] sm:$0x3] }
 0xbba   :  { %4869 = vtanh.f32 %v1472_v8 }
 0xbc4   :  { %v4870_v9 = vpop.eup %4869 }
 0xbc5   :  { %v5667_v10 = vmul.f32 %v4870_v9, %v1465_v3 }
 0xbc7   :  { %1476 = vrot.lane.b32.xlu0 %v5667_v10, %s5271_s9 }
 0xc39   :  { %v1477_v11 = vpop.permute.xlu0 %1476 }
 0xc3a   :  { %3918 = vmatmul.mubr.msk.f32.vlgmr.msra.gmra.mrb[6].mxu0 %vm854_vm1, %v1477_v11 }
 0xc3b   :  { %1824 = vmatprep.mubr.f32.mxu0 %v5270_v0  ;;  %4366 = vmatpush1.bf16.msra.mxu0 %v5688_v48 }
 0xc3c   :  { %4368 = vmatprep.subr.bf16.mxu0 %v5695_v54 }
 0xc3f   :  { %4370 = vmatpush1.bf16.msra.mxu0 %v5697_v59 }
 0xc40   :  { %4372 = vmatprep.subr.bf16.mxu0 %v5702_v19 }
 0xc43   :  { %4374 = vmatpush1.bf16.msra.mxu0 %v5704_v20 }
 0xc44   :  { %4376 = vmatprep.subr.bf16.mxu0 %v5708_v26 }
 0xc47   :  { %4378 = vmatpush1.bf16.msra.mxu0 %v5710_v35 }
 0xc48   :  { %4396 = vmatprep.subr.bf16.mxu0 %v5686_v46 }
 0xd0d   :  { %v1546_v12 = vpop.f32.mrb[6].mxu0 }
 0xd0e   :  { %v4727_v14 = vadd.f32 %v1546_v12, %v5538_v42  ;;  %v1548_v15 = vpop.f32.mrb[7].mxu0 }
 0xd0f   :  { %v4728_v13 = vadd.f32 %v1548_v15, %v5542_v43 }
 0xd10   :  { %v3919_v16 = vmul.f32 -1.442695, %v4727_v14 }
 0xd11   :  { %v3920_v17 = vmul.f32 -1.442695, %v4728_v13 }
 0xd12   :  { %4871 = vpow2.f32 %v3919_v16 }
 0xd13   :  { %4873 = vpow2.f32 %v3920_v17 }
 0xd14   :  { %4875 = vtanh.f32 %v4728_v13 }
 0xd1c   :  { %v4872_v18 = vpop.eup %4871 }
 0xd1d   :  { %v4874_v21 = vpop.eup %4873  ;;  %v1561_v22 = vadd.f32 1.0, %v4872_v18 }
 0xd1e   :  { %v1562_v23 = vadd.f32 1.0, %v4874_v21  ;;  %v4876_v27 = vpop.eup %4875 }
 0xd20   :  { %4877 = vrcp.f32 %v1562_v23 }
 0xd21   :  { %4879 = vrcp.f32 %v1561_v22 }
 0xd2a   :  { %v4878_v28 = vpop.eup %4877 }
 0xd2b   :  { %v4880_v29 = vpop.eup %4879  ;;  %v1568_v30 = vsel %vm230_vm2, %v4876_v27, %v4878_v28 }
 0xd2c   :  { %v1570_v33 = vmul.f32 %v4880_v29, %v1568_v30  ;;  %v1569_v49 = vmul.f32 %v4880_v29, %v1472_v8  ;;  %v3929_v8 = vld [vmem:[%s6203_s11 + $0xc] sm:$0x3] }
 0xd2e   :  { %1572 = vrot.lane.b32.xlu1 %v1570_v33, %s5271_s9 }
 0xd32   :  { %1684 = vrot.lane.b32.xlu1 %v1682_v34, %s5271_s9 }
 0xd36   :  { %1716 = vrot.lane.b32.xlu1 %v3927_v37, %s5271_s9 }
 0xda0   :  { %v1573_v50 = vpop.permute.xlu1 %1572 }
 0xda1   :  { %v5693_v53 = vadd.f32 %v1573_v50, %v1569_v49  ;;  %v3928_v50 = vld [vmem:[%s6203_s11 + $0xa] sm:$0x3] }
 0xda3   :  { %4881 = vtanh.f32 %v5693_v53 }
 0xda4   :  { %4883 = vtanh.f32 %v5574_v7  ;;  %v1685_v6 = vpop.permute.xlu1 %1684 }
 0xda5   :  { %4885 = vtanh.f32 %v5649_v57 }
 0xda6   :  { %4887 = vtanh.f32 %v5612_v63 }
 0xda8   :  { %v1717_v7 = vpop.permute.xlu1 %1716 }
 0xdad   :  { %v4882_v3 = vpop.eup %4881 }
 0xdae   :  { %v1577_v4 = vmul.f32 %v4882_v3, %v1568_v30  ;;  %v4884_v9 = vpop.eup %4883  ;;  %v201_v3 = vld [vmem:[#allocation13 + $0x18] sm:$0xff] }
 0xdaf   :  { %v1687_v11 = vmul.f32 %v4884_v9, %v1685_v6  ;;  %v4886_v12 = vpop.eup %4885  ;;  %v5801_v6 = vpack.c.bf16 %v201_v3, %v199_v32  ;;  %v200_v9 = vld [vmem:[#allocation13 + $0x10] sm:$0xff] }
 0xdb0   :  { %1579 = vrot.lane.b32.xlu0 %v1577_v4, %s5271_s9  ;;  %v1719_v14 = vmul.f32 %v4886_v12, %v1717_v7  ;;  %4889 = vtanh.f32 %v1577_v4  ;;  %v4888_v15 = vpop.eup %4887  ;;  %v205_v7 = vld [vmem:[#allocation13 + $0x38] sm:$0xff] }
 0xdb4   :  { %1700 = vrot.lane.b32.xlu0 %v3925_v5, %s5271_s9 }
 0xdb8   :  { %1732 = vrot.lane.b32.xlu0 %v3929_v8, %s5271_s9  ;;  %v198_v8 = vld [vmem:[#allocation13] sm:$0xff] }
 0xdb9   :  { %v5805_v12 = vpack.c.bf16 %v200_v9, %v198_v8 }
 0xdba   :  { %v4890_v17 = vpop.eup %4889 }
 0xdbc   :  { %1756 = vrot.lane.b32.xlu0 %v1687_v11, %s5271_s9  ;;  %v203_v11 = vld [vmem:[#allocation13 + $0x28] sm:$0xff] }
 0xdc0   :  { %2060 = vrot.lane.b32.xlu0 %v1719_v14, %s5271_s9  ;;  %v5808_v14 = vpack.c.bf16 %v205_v7, %v203_v11 }
 0xe22   :  { %v1580_v57 = vpop.permute.xlu0 %1579 }
 0xe23   :  { %3921 = vmatmul.mubr.msk.f32.vlgmr.msra.gmra.mrb[6].mxu1 %vm854_vm1, %v1580_v57  ;;  %v202_v57 = vld [vmem:[#allocation13 + $0x20] sm:$0xff] }
 0xe24   :  { %4382 = vmatpush1.bf16.msra.mxu1 %v5688_v48  ;;  %1900 = vmatprep.mubr.f32.mxu1 %v5270_v0 }
 0xe25   :  { %4384 = vmatprep.subr.bf16.mxu1 %v5695_v54 }
 0xe26   :  { %v1701_v13 = vpop.permute.xlu0 %1700 }
 0xe27   :  { %v1703_v16 = vmul.f32 %v4888_v15, %v1701_v13  ;;  %v204_v15 = vld [vmem:[#allocation13 + $0x30] sm:$0xff]  ;;  %v207_v13 = vld [vmem:[#allocation13 + $0x48] sm:$0xff] }
 0xe28   :  { %4386 = vmatpush1.bf16.msra.mxu1 %v5697_v59 }
 0xe29   :  { %4388 = vmatprep.subr.bf16.mxu1 %v5702_v19 }
 0xe2a   :  { %v1733_v18 = vpop.permute.xlu0 %1732 }
 0xe2b   :  { %v1735_v63 = vmul.f32 %v4890_v17, %v1733_v18  ;;  %v5812_v17 = vpack.c.bf16 %v204_v15, %v202_v57 }
 0xe2c   :  { %4390 = vmatpush1.bf16.msra.mxu1 %v5704_v20 }
 0xe2d   :  { %4392 = vmatprep.subr.bf16.mxu1 %v5708_v26 }
 0xe2e   :  { %v1757_v21 = vpop.permute.xlu0 %1756 }
 0xe2f   :  { %3931 = vmatmul.mubr.msk.f32.vlgmr.msra.gmra.mrb[8].mxu0 %vm854_vm1, %v1757_v21  ;;  %v208_v21 = vld [vmem:[#allocation13 + $0x50] sm:$0xff] }
 0xe30   :  { %4398 = vmatpush1.bf16.msra.mxu0 %v5688_v48  ;;  %1976 = vmatprep.mubr.f32.mxu0 %v5270_v0 }
 0xe31   :  { %4400 = vmatprep.subr.bf16.mxu0 %v5695_v54  ;;  %4394 = vmatpush1.bf16.msra.mxu1 %v5710_v35 }
 0xe32   :  { %4412 = vmatprep.subr.bf16.mxu1 %v5686_v46  ;;  %v2061_v1 = vpop.permute.xlu0 %2060 }
 0xe34   :  { %4402 = vmatpush1.bf16.msra.mxu0 %v5697_v59 }
 0xe35   :  { %4404 = vmatprep.subr.bf16.mxu0 %v5702_v19 }
 0xe38   :  { %4406 = vmatpush1.bf16.msra.mxu0 %v5704_v20 }
 0xe39   :  { %4408 = vmatprep.subr.bf16.mxu0 %v5708_v26 }
 0xe3c   :  { %4410 = vmatpush1.bf16.msra.mxu0 %v5710_v35 }
 0xe3d   :  { %4428 = vmatprep.subr.bf16.mxu0 %v5686_v46 }
 0xef6   :  { %v1649_v22 = vpop.f32.mrb[6].mxu1 }
 0xef7   :  { %v4729_v23 = vadd.f32 %v1649_v22, %v5538_v42  ;;  %v1651_v27 = vpop.f32.mrb[7].mxu1  ;;  %v211_v22 = vld [vmem:[#allocation13 + $0x68] sm:$0xff] }
 0xef8   :  { %v4730_v28 = vadd.f32 %v1651_v27, %v5542_v43  ;;  %v3924_v43 = vld [vmem:[%s6203_s11 + $0x2] sm:$0x3] }
 0xef9   :  { %v3922_v29 = vmul.f32 -1.442695, %v4729_v23  ;;  %v213_v23 = vld [vmem:[#allocation13 + $0x78] sm:$0xff] }
 0xefa   :  { %v3923_v30 = vmul.f32 -1.442695, %v4730_v28 }
 0xefb   :  { %4891 = vpow2.f32 %v3922_v29  ;;  %v210_v29 = vld [vmem:[#allocation13 + $0x60] sm:$0xff] }
 0xefc   :  { %4893 = vpow2.f32 %v3923_v30  ;;  %v212_v30 = vld [vmem:[#allocation13 + $0x70] sm:$0xff] }
 0xefd   :  { %4895 = vtanh.f32 %v4730_v28  ;;  %v5822_v28 = vpack.c.bf16 %v213_v23, %v211_v22 }
 0xf05   :  { %v4892_v33 = vpop.eup %4891 }
 0xf06   :  { %v4894_v34 = vpop.eup %4893  ;;  %v1664_v37 = vadd.f32 1.0, %v4892_v33  ;;  %v5825_v33 = vpack.c.bf16 %v212_v30, %v210_v29 }
 0xf07   :  { %v1665_v40 = vadd.f32 1.0, %v4894_v34  ;;  %v4896_v44 = vpop.eup %4895 }
 0xf09   :  { %4897 = vrcp.f32 %v1665_v40 }
 0xf0a   :  { %4899 = vrcp.f32 %v1664_v37 }
 0xf13   :  { %v4898_v45 = vpop.eup %4897 }
 0xf14   :  { %v4900_v47 = vpop.eup %4899  ;;  %v1671_v42 = vsel %vm230_vm2, %v4896_v44, %v4898_v45 }
 0xf15   :  { %v1673_v49 = vmul.f32 %v4900_v47, %v1671_v42  ;;  %v1672_v51 = vmul.f32 %v4900_v47, %v5693_v53 }
 0xf17   :  { %1675 = vrot.lane.b32.xlu1 %v1673_v49, %s5271_s9  ;;  %v214_v49 = vld [vmem:[#allocation14] sm:$0x3] }
 0xf1b   :  { %1908 = vrot.lane.b32.xlu1 %v1703_v16, %s5271_s9  ;;  %v209_v16 = vld [vmem:[#allocation13 + $0x58] sm:$0xff] }
 0xf1c   :  { %v5816_v18 = vpack.c.bf16 %v209_v16, %v207_v13 }
 0xf1f   :  { %2212 = vrot.lane.b32.xlu1 %v1735_v63, %s5271_s9  ;;  %v206_v63 = vld [vmem:[#allocation13 + $0x40] sm:$0xff] }
 0xf20   :  { %v5819_v27 = vpack.c.bf16 %v208_v21, %v206_v63 }
 0xf23   :  { %1692 = vrot.lane.b32.xlu1 %v3924_v43, %s5271_s9  ;;  %v5854_v43 = vrot.slane %v214_v49, %v237_v39 }
 0xf27   :  { %1724 = vrot.lane.b32.xlu1 %v3928_v50, %s5271_s9  ;;  %v5858_v50 = vrot.slane %v214_v49, %v241_v41 }
 0xf89   :  { %v1676_v52 = vpop.permute.xlu1 %1675 }
 0xf8a   :  { %v5765_v56 = vadd.f32 %v1676_v52, %v1672_v51 }
 0xf8c   :  { %4901 = vtanh.f32 %v5765_v56 }
 0xf8d   :  { %v1909_v58 = vpop.permute.xlu1 %1908  ;;  %4903 = vtanh.f32 %v5593_v36 }
 0xf8e   :  { %3933 = vmatmul.mubr.msk.f32.vlgmr.msra.gmra.mrb[10].mxu0 %vm854_vm1, %v1909_v58  ;;  %4905 = vtanh.f32 %v5667_v10 }
 0xf8f   :  { %4430 = vmatpush1.bf16.msra.mxu0 %v5688_v48  ;;  %2128 = vmatprep.mubr.f32.mxu0 %v5270_v0  ;;  %4907 = vtanh.f32 %v5631_v24 }
 0xf90   :  { %4432 = vmatprep.subr.bf16.mxu0 %v5695_v54 }
 0xf91   :  { %v2213_v61 = vpop.permute.xlu1 %2212 }
 0xf93   :  { %4434 = vmatpush1.bf16.msra.mxu0 %v5697_v59 }
 0xf94   :  { %4436 = vmatprep.subr.bf16.mxu0 %v5702_v19 }
 0xf95   :  { %v1693_v36 = vpop.permute.xlu1 %1692 }
 0xf96   :  { %v4902_v60 = vpop.eup %4901 }
 0xf97   :  { %4438 = vmatpush1.bf16.msra.mxu0 %v5704_v20  ;;  %v5775_v53 = vmul.f32 %v4902_v60, %v1671_v42  ;;  %v4904_v10 = vpop.eup %4903 }
 0xf98   :  { %4440 = vmatprep.subr.bf16.mxu0 %v5708_v26  ;;  %v1695_v2 = vmul.f32 %v4904_v10, %v1693_v36  ;;  %v4906_v4 = vpop.eup %4905 }
 0xf99   :  { %2364 = vrot.lane.b32.xlu0 %v5775_v53, %s5271_s9  ;;  %v1725_v31 = vpop.permute.xlu1 %1724  ;;  %4909 = vtanh.f32 %v5775_v53  ;;  %v4908_v37 = vpop.eup %4907 }
 0xf9a   :  { %v1727_v5 = vmul.f32 %v4906_v4, %v1725_v31 }
 0xf9b   :  { %4442 = vmatpush1.bf16.msra.mxu0 %v5710_v35 }
 0xf9c   :  { %4460 = vmatprep.subr.bf16.mxu0 %v5686_v46 }
 0xf9d   :  { %1708 = vrot.lane.b32.xlu0 %v3926_v62, %s5271_s9 }
 0xf9e   :  { %3935 = vmatmul.mubr.msk.f32.vlgmr.msra.gmra.mrb[12].mxu0 %vm854_vm1, %v2061_v1 }
 0xf9f   :  { %4462 = vmatpush1.bf16.msra.mxu0 %v5688_v48  ;;  %2280 = vmatprep.mubr.f32.mxu0 %v5270_v0 }
 0xfa0   :  { %4464 = vmatprep.subr.bf16.mxu0 %v5695_v54 }
 0xfa1   :  { %1740 = vrot.lane.b32.xlu0 %v3930_v25, %s5271_s9 }
 0xfa3   :  { %4466 = vmatpush1.bf16.msra.mxu0 %v5697_v59  ;;  %v4910_v45 = vpop.eup %4909 }
 0xfa4   :  { %4468 = vmatprep.subr.bf16.mxu0 %v5702_v19 }
 0xfa5   :  { %1832 = vrot.lane.b32.xlu0 %v1695_v2, %s5271_s9 }
 0xfa7   :  { %4470 = vmatpush1.bf16.msra.mxu0 %v5704_v20 }
 0xfa8   :  { %4472 = vmatprep.subr.bf16.mxu0 %v5708_v26 }
 0xfa9   :  { %2136 = vrot.lane.b32.xlu0 %v1727_v5, %s5271_s9 }
 0xfab   :  { %4474 = vmatpush1.bf16.msra.mxu0 %v5710_v35 }
 0xfac   :  { %4492 = vmatprep.subr.bf16.mxu0 %v5801_v6 }
 0xfae   :  { %3937 = vmatmul.mubr.msk.f32.vlgmr.msra.gmra.mrb[14].mxu0 %vm854_vm1, %v2213_v61 }
 0xfaf   :  { %4494 = vmatpush1.bf16.msra.mxu0 %v5805_v12  ;;  %2432 = vmatprep.mubr.f32.mxu0 %v5270_v0 }
 0xfb0   :  { %4496 = vmatprep.subr.bf16.mxu0 %v5808_v14 }
 0xfb3   :  { %4498 = vmatpush1.bf16.msra.mxu0 %v5812_v17 }
 0xfb4   :  { %4500 = vmatprep.subr.bf16.mxu0 %v5816_v18 }
 0xfb7   :  { %4502 = vmatpush1.bf16.msra.mxu0 %v5819_v27 }
 0xfb8   :  { %4504 = vmatprep.subr.bf16.mxu0 %v5822_v28 }
 0xfbb   :  { %4506 = vmatpush1.bf16.msra.mxu0 %v5825_v33 }
 0xfbc   :  { %4524 = vmatprep.subr.bf16.mxu0 %v5801_v6 }
0x100b   :  { %v2365_v34 = vpop.permute.xlu0 %2364 }
0x100c   :  { %3939 = vmatmul.mubr.msk.f32.vlgmr.msra.gmra.mrb[8].mxu0 %vm854_vm1, %v2365_v34 }
0x100d   :  { %4526 = vmatpush1.bf16.msra.mxu0 %v5805_v12  ;;  %2638 = vmatprep.mubr.f32.mxu0 %v5270_v0 }
0x100e   :  { %4528 = vmatprep.subr.bf16.mxu0 %v5808_v14 }
0x100f   :  { %v1709_v40 = vpop.permute.xlu0 %1708 }
0x1010   :  { %v1711_v44 = vmul.f32 %v4908_v37, %v1709_v40 }
0x1011   :  { %4530 = vmatpush1.bf16.msra.mxu0 %v5812_v17 }
0x1012   :  { %4532 = vmatprep.subr.bf16.mxu0 %v5816_v18 }
0x1013   :  { %v1741_v24 = vpop.permute.xlu0 %1740 }
0x1014   :  { %v1743_v47 = vmul.f32 %v4910_v45, %v1741_v24 }
0x1015   :  { %4534 = vmatpush1.bf16.msra.mxu0 %v5819_v27 }
0x1016   :  { %4536 = vmatprep.subr.bf16.mxu0 %v5822_v28 }
0x1017   :  { %v1833_v42 = vpop.permute.xlu0 %1832 }
0x1018   :  { %3932 = vmatmul.mubr.msk.f32.vlgmr.msra.gmra.mrb[8].mxu1 %vm854_vm1, %v1833_v42 }
0x1019   :  { %4414 = vmatpush1.bf16.msra.mxu1 %v5688_v48  ;;  %2052 = vmatprep.mubr.f32.mxu1 %v5270_v0 }
0x101a   :  { %4416 = vmatprep.subr.bf16.mxu1 %v5695_v54  ;;  %4538 = vmatpush1.bf16.msra.mxu0 %v5825_v33 }
0x101b   :  { %4556 = vmatprep.subr.bf16.mxu0 %v5801_v6  ;;  %v2137_v8 = vpop.permute.xlu0 %2136 }
0x101d   :  { %4418 = vmatpush1.bf16.msra.mxu1 %v5697_v59 }
0x101e   :  { %4420 = vmatprep.subr.bf16.mxu1 %v5702_v19 }
0x1021   :  { %4422 = vmatpush1.bf16.msra.mxu1 %v5704_v20 }
0x1022   :  { %4424 = vmatprep.subr.bf16.mxu1 %v5708_v26 }
0x1025   :  { %4426 = vmatpush1.bf16.msra.mxu1 %v5710_v35 }
0x1026   :  { %4444 = vmatprep.subr.bf16.mxu1 %v5686_v46 }
0x10df   :  { %v2434_v51 = vpop.f32.mrb[8].mxu0 }
0x10e0   :  { %v4731_v52 = vadd.f32 %v2434_v51, %v5854_v43  ;;  %v2436_v58 = vpop.f32.mrb[9].mxu0 }
0x10e1   :  { %v4732_v60 = vadd.f32 %v2436_v58, %v5858_v50 }
0x10e2   :  { %v3940_v53 = vmul.f32 -1.442695, %v4731_v52 }
0x10e3   :  { %v3941_v61 = vmul.f32 -1.442695, %v4732_v60 }
0x10e4   :  { %4911 = vpow2.f32 %v3940_v53 }
0x10e5   :  { %4913 = vpow2.f32 %v3941_v61 }
0x10e6   :  { %4915 = vtanh.f32 %v4732_v60 }
0x10ee   :  { %v4912_v62 = vpop.eup %4911 }
0x10ef   :  { %v4914_v1 = vpop.eup %4913  ;;  %v2449_v36 = vadd.f32 1.0, %v4912_v62 }
0x10f0   :  { %v2450_v25 = vadd.f32 1.0, %v4914_v1  ;;  %v4916_v38 = vpop.eup %4915 }
0x10f2   :  { %4917 = vrcp.f32 %v2450_v25 }
0x10f3   :  { %4919 = vrcp.f32 %v2449_v36 }
0x10fc   :  { %v4918_v39 = vpop.eup %4917 }
0x10fd   :  { %v4920_v41 = vpop.eup %4919  ;;  %v2456_v10 = vsel %vm230_vm2, %v4916_v38, %v4918_v39 }
0x10fe   :  { %v2458_v2 = vmul.f32 %v4920_v41, %v2456_v10  ;;  %v2457_v31 = vmul.f32 %v4920_v41, %v5765_v56 }
0x1100   :  { %2460 = vrot.lane.b32.xlu1 %v2458_v2, %s5271_s9 }
0x1104   :  { %1984 = vrot.lane.b32.xlu1 %v1711_v44, %s5271_s9 }
0x1108   :  { %2288 = vrot.lane.b32.xlu1 %v1743_v47, %s5271_s9 }
0x1172   :  { %v2461_v32 = vpop.permute.xlu1 %2460 }
0x1173   :  { %v5868_v3 = vadd.f32 %v2461_v32, %v2457_v31 }
0x1175   :  { %4921 = vtanh.f32 %v5868_v3 }
0x1176   :  { %v1985_v4 = vpop.permute.xlu1 %1984 }
0x1177   :  { %3934 = vmatmul.mubr.msk.f32.vlgmr.msra.gmra.mrb[10].mxu1 %vm854_vm1, %v1985_v4 }
0x1178   :  { %4446 = vmatpush1.bf16.msra.mxu1 %v5688_v48  ;;  %2204 = vmatprep.mubr.f32.mxu1 %v5270_v0 }
0x1179   :  { %4448 = vmatprep.subr.bf16.mxu1 %v5695_v54 }
0x117c   :  { %4450 = vmatpush1.bf16.msra.mxu1 %v5697_v59 }
0x117d   :  { %4452 = vmatprep.subr.bf16.mxu1 %v5702_v19 }
0x117f   :  { %v4922_v5 = vpop.eup %4921 }
0x1180   :  { %4454 = vmatpush1.bf16.msra.mxu1 %v5704_v20  ;;  %v5878_v56 = vmul.f32 %v4922_v5, %v2456_v10 }
0x1181   :  { %4456 = vmatprep.subr.bf16.mxu1 %v5708_v26 }
0x1182   :  { %2467 = vrot.lane.b32.xlu0 %v5878_v56, %s5271_s9 }
0x1184   :  { %4458 = vmatpush1.bf16.msra.mxu1 %v5710_v35 }
0x1185   :  { %4476 = vmatprep.subr.bf16.mxu1 %v5686_v46  ;;  %v2289_v46 = vpop.permute.xlu1 %2288 }
0x1187   :  { %3936 = vmatmul.mubr.msk.f32.vlgmr.msra.gmra.mrb[12].mxu1 %vm854_vm1, %v2137_v8 }
0x1188   :  { %4478 = vmatpush1.bf16.msra.mxu1 %v5688_v48  ;;  %2356 = vmatprep.mubr.f32.mxu1 %v5270_v0 }
0x1189   :  { %4480 = vmatprep.subr.bf16.mxu1 %v5695_v54 }
0x118c   :  { %4482 = vmatpush1.bf16.msra.mxu1 %v5697_v59 }
0x118d   :  { %4484 = vmatprep.subr.bf16.mxu1 %v5702_v19 }
0x1190   :  { %4486 = vmatpush1.bf16.msra.mxu1 %v5704_v20 }
0x1191   :  { %4488 = vmatprep.subr.bf16.mxu1 %v5708_v26 }
0x1194   :  { %4490 = vmatpush1.bf16.msra.mxu1 %v5710_v35 }
0x1195   :  { %4508 = vmatprep.subr.bf16.mxu1 %v5801_v6 }
0x1197   :  { %3938 = vmatmul.mubr.msk.f32.vlgmr.msra.gmra.mrb[14].mxu1 %vm854_vm1, %v2289_v46 }
0x1198   :  { %4510 = vmatpush1.bf16.msra.mxu1 %v5805_v12  ;;  %2535 = vmatprep.mubr.f32.mxu1 %v5270_v0 }
0x1199   :  { %4512 = vmatprep.subr.bf16.mxu1 %v5808_v14 }
0x119c   :  { %4514 = vmatpush1.bf16.msra.mxu1 %v5812_v17 }
0x119d   :  { %4516 = vmatprep.subr.bf16.mxu1 %v5816_v18 }
0x11a0   :  { %4518 = vmatpush1.bf16.msra.mxu1 %v5819_v27 }
0x11a1   :  { %4520 = vmatprep.subr.bf16.mxu1 %v5822_v28 }
0x11a4   :  { %4522 = vmatpush1.bf16.msra.mxu1 %v5825_v33 }
0x11a5   :  { %4540 = vmatprep.subr.bf16.mxu1 %v5801_v6 }
0x11f4   :  { %v2468_v48 = vpop.permute.xlu0 %2467 }
0x11f5   :  { %3942 = vmatmul.mubr.msk.f32.vlgmr.msra.gmra.mrb[8].mxu1 %vm854_vm1, %v2468_v48 }
0x11f6   :  { %4542 = vmatpush1.bf16.msra.mxu1 %v5805_v12  ;;  %2741 = vmatprep.mubr.f32.mxu1 %v5270_v0 }
0x11f7   :  { %4544 = vmatprep.subr.bf16.mxu1 %v5808_v14 }
0x11fa   :  { %4546 = vmatpush1.bf16.msra.mxu1 %v5812_v17 }
0x11fb   :  { %4548 = vmatprep.subr.bf16.mxu1 %v5816_v18 }
0x11fe   :  { %4550 = vmatpush1.bf16.msra.mxu1 %v5819_v27 }
0x11ff   :  { %4552 = vmatprep.subr.bf16.mxu1 %v5822_v28 }
0x1202   :  { %4554 = vmatpush1.bf16.msra.mxu1 %v5825_v33 }
0x1203   :  { %4572 = vmatprep.subr.bf16.mxu1 %v5801_v6 }
0x12c8   :  { %v2537_v54 = vpop.f32.mrb[8].mxu1 }
0x12c9   :  { %v4733_v59 = vadd.f32 %v2537_v54, %v5854_v43  ;;  %v2539_v19 = vpop.f32.mrb[9].mxu1 }
0x12ca   :  { %v4734_v20 = vadd.f32 %v2539_v19, %v5858_v50 }
0x12cb   :  { %v3943_v26 = vmul.f32 -1.442695, %v4733_v59 }
0x12cc   :  { %v3944_v35 = vmul.f32 -1.442695, %v4734_v20 }
0x12cd   :  { %4923 = vpow2.f32 %v3943_v26 }
0x12ce   :  { %4925 = vpow2.f32 %v3944_v35 }
0x12cf   :  { %4927 = vtanh.f32 %v4734_v20 }
0x12d7   :  { %v4924_v9 = vpop.eup %4923 }
0x12d8   :  { %v4926_v11 = vpop.eup %4925  ;;  %v2552_v7 = vadd.f32 1.0, %v4924_v9 }
0x12d9   :  { %v2553_v57 = vadd.f32 1.0, %v4926_v11  ;;  %v4928_v15 = vpop.eup %4927 }
0x12db   :  { %4929 = vrcp.f32 %v2553_v57 }
0x12dc   :  { %4931 = vrcp.f32 %v2552_v7 }
0x12e5   :  { %v4930_v13 = vpop.eup %4929 }
0x12e6   :  { %v4932_v16 = vpop.eup %4931  ;;  %v2559_v63 = vsel %vm230_vm2, %v4928_v15, %v4930_v13 }
0x12e7   :  { %v2561_v21 = vmul.f32 %v4932_v16, %v2559_v63  ;;  %v2560_v22 = vmul.f32 %v4932_v16, %v5868_v3 }
0x12e9   :  { %2563 = vrot.lane.b32.xlu1 %v2561_v21, %s5271_s9 }
0x135b   :  { %v2564_v23 = vpop.permute.xlu1 %2563 }
0x135c   :  { %v2566_v29 = vadd.f32 %v2564_v23, %v2560_v22 }
0x135e   :  { %4933 = vtanh.f32 %v2566_v29 }
0x1368   :  { %v4934_v30 = vpop.eup %4933 }
0x1369   :  { %v5921_v34 = vmul.f32 %v4934_v30, %v2559_v63 }
0x136b   :  { %2570 = vrot.lane.b32.xlu0 %v5921_v34, %s5271_s9 }
0x13dd   :  { %v2571_v37 = vpop.permute.xlu0 %2570 }
0x13de   :  { %3945 = vmatmul.mubr.msk.f32.vlgmr.msra.gmra.mrb[10].mxu0 %vm854_vm1, %v2571_v37 }
0x13df   :  { %4558 = vmatpush1.bf16.msra.mxu0 %v5805_v12  ;;  %2844 = vmatprep.mubr.f32.mxu0 %v5270_v0 }
0x13e0   :  { %4560 = vmatprep.subr.bf16.mxu0 %v5808_v14 }
0x13e3   :  { %4562 = vmatpush1.bf16.msra.mxu0 %v5812_v17 }
0x13e4   :  { %4564 = vmatprep.subr.bf16.mxu0 %v5816_v18 }
0x13e7   :  { %4566 = vmatpush1.bf16.msra.mxu0 %v5819_v27 }
0x13e8   :  { %4568 = vmatprep.subr.bf16.mxu0 %v5822_v28 }
0x13eb   :  { %4570 = vmatpush1.bf16.msra.mxu0 %v5825_v33 }
0x13ec   :  { %4588 = vmatprep.subr.bf16.mxu0 %v5801_v6 }
0x14b1   :  { %v2640_v40 = vpop.f32.mrb[10].mxu0 }
0x14b2   :  { %v4735_v44 = vadd.f32 %v2640_v40, %v5854_v43  ;;  %v2642_v45 = vpop.f32.mrb[11].mxu0 }
0x14b3   :  { %v4736_v24 = vadd.f32 %v2642_v45, %v5858_v50 }
0x14b4   :  { %v3946_v47 = vmul.f32 -1.442695, %v4735_v44 }
0x14b5   :  { %v3947_v42 = vmul.f32 -1.442695, %v4736_v24 }
0x14b6   :  { %4935 = vpow2.f32 %v3946_v47 }
0x14b7   :  { %4937 = vpow2.f32 %v3947_v42 }
0x14b8   :  { %4939 = vtanh.f32 %v4736_v24 }
0x14c0   :  { %v4936_v49 = vpop.eup %4935 }
0x14c1   :  { %v4938_v51 = vpop.eup %4937  ;;  %v2655_v52 = vadd.f32 1.0, %v4936_v49 }
0x14c2   :  { %v2656_v58 = vadd.f32 1.0, %v4938_v51  ;;  %v4940_v60 = vpop.eup %4939 }
0x14c4   :  { %4941 = vrcp.f32 %v2656_v58 }
0x14c5   :  { %4943 = vrcp.f32 %v2655_v52 }
0x14ce   :  { %v4942_v53 = vpop.eup %4941 }
0x14cf   :  { %v4944_v61 = vpop.eup %4943  ;;  %v2662_v62 = vsel %vm230_vm2, %v4940_v60, %v4942_v53 }
0x14d0   :  { %v2664_v1 = vmul.f32 %v4944_v61, %v2662_v62  ;;  %v2663_v36 = vmul.f32 %v4944_v61, %v2566_v29 }
0x14d2   :  { %2666 = vrot.lane.b32.xlu1 %v2664_v1, %s5271_s9 }
0x1544   :  { %v2667_v25 = vpop.permute.xlu1 %2666 }
0x1545   :  { %v2669_v38 = vadd.f32 %v2667_v25, %v2663_v36 }
0x1547   :  { %4945 = vtanh.f32 %v2669_v38 }
0x1551   :  { %v4946_v39 = vpop.eup %4945 }
0x1552   :  { %v5940_v41 = vmul.f32 %v4946_v39, %v2662_v62 }
0x1554   :  { %2673 = vrot.lane.b32.xlu0 %v5940_v41, %s5271_s9 }
0x15c6   :  { %v2674_v10 = vpop.permute.xlu0 %2673 }
0x15c7   :  { %3948 = vmatmul.mubr.msk.f32.vlgmr.msra.gmra.mrb[10].mxu1 %vm854_vm1, %v2674_v10 }
0x15c8   :  { %4574 = vmatpush1.bf16.msra.mxu1 %v5805_v12  ;;  %2947 = vmatprep.mubr.f32.mxu1 %v5270_v0 }
0x15c9   :  { %4576 = vmatprep.subr.bf16.mxu1 %v5808_v14 }
0x15cc   :  { %4578 = vmatpush1.bf16.msra.mxu1 %v5812_v17 }
0x15cd   :  { %4580 = vmatprep.subr.bf16.mxu1 %v5816_v18 }
0x15d0   :  { %4582 = vmatpush1.bf16.msra.mxu1 %v5819_v27 }
0x15d1   :  { %4584 = vmatprep.subr.bf16.mxu1 %v5822_v28 }
0x15d4   :  { %4586 = vmatpush1.bf16.msra.mxu1 %v5825_v33 }
0x15d5   :  { %4604 = vmatprep.subr.bf16.mxu1 %v5801_v6 }
0x169a   :  { %v2743_v2 = vpop.f32.mrb[10].mxu1 }
0x169b   :  { %v4737_v31 = vadd.f32 %v2743_v2, %v5854_v43  ;;  %v2745_v32 = vpop.f32.mrb[11].mxu1 }
0x169c   :  { %v4738_v3 = vadd.f32 %v2745_v32, %v5858_v50 }
0x169d   :  { %v3949_v4 = vmul.f32 -1.442695, %v4737_v31 }
0x169e   :  { %v3950_v5 = vmul.f32 -1.442695, %v4738_v3 }
0x169f   :  { %4947 = vpow2.f32 %v3949_v4 }
0x16a0   :  { %4949 = vpow2.f32 %v3950_v5 }
0x16a1   :  { %4951 = vtanh.f32 %v4738_v3 }
0x16a9   :  { %v4948_v8 = vpop.eup %4947 }
0x16aa   :  { %v4950_v46 = vpop.eup %4949  ;;  %v2758_v48 = vadd.f32 1.0, %v4948_v8 }
0x16ab   :  { %v2759_v54 = vadd.f32 1.0, %v4950_v46  ;;  %v4952_v59 = vpop.eup %4951 }
0x16ad   :  { %4953 = vrcp.f32 %v2759_v54 }
0x16ae   :  { %4955 = vrcp.f32 %v2758_v48 }
0x16b7   :  { %v4954_v19 = vpop.eup %4953 }
0x16b8   :  { %v4956_v6 = vpop.eup %4955  ;;  %v2765_v20 = vsel %vm230_vm2, %v4952_v59, %v4954_v19 }
0x16b9   :  { %v2767_v26 = vmul.f32 %v4956_v6, %v2765_v20  ;;  %v2766_v35 = vmul.f32 %v4956_v6, %v2669_v38 }
0x16bb   :  { %2769 = vrot.lane.b32.xlu1 %v2767_v26, %s5271_s9 }
0x172d   :  { %v2770_v9 = vpop.permute.xlu1 %2769 }
0x172e   :  { %v2772_v11 = vadd.f32 %v2770_v9, %v2766_v35 }
0x1730   :  { %4957 = vtanh.f32 %v2772_v11 }
0x173a   :  { %v4958_v7 = vpop.eup %4957 }
0x173b   :  { %v5959_v57 = vmul.f32 %v4958_v7, %v2765_v20 }
0x173d   :  { %2776 = vrot.lane.b32.xlu0 %v5959_v57, %s5271_s9 }
0x17af   :  { %v2777_v15 = vpop.permute.xlu0 %2776 }
0x17b0   :  { %3951 = vmatmul.mubr.msk.f32.vlgmr.msra.gmra.mrb[12].mxu0 %vm854_vm1, %v2777_v15 }
0x17b1   :  { %4590 = vmatpush1.bf16.msra.mxu0 %v5805_v12  ;;  %3050 = vmatprep.mubr.f32.mxu0 %v5270_v0 }
0x17b2   :  { %4592 = vmatprep.subr.bf16.mxu0 %v5808_v14 }
0x17b5   :  { %4594 = vmatpush1.bf16.msra.mxu0 %v5812_v17 }
0x17b6   :  { %4596 = vmatprep.subr.bf16.mxu0 %v5816_v18 }
0x17b9   :  { %4598 = vmatpush1.bf16.msra.mxu0 %v5819_v27 }
0x17ba   :  { %4600 = vmatprep.subr.bf16.mxu0 %v5822_v28 }
0x17bd   :  { %4602 = vmatpush1.bf16.msra.mxu0 %v5825_v33 }
0x1883   :  { %v2846_v13 = vpop.f32.mrb[12].mxu0 }
0x1884   :  { %v4739_v16 = vadd.f32 %v2846_v13, %v5854_v43  ;;  %v2848_v63 = vpop.f32.mrb[13].mxu0 }
0x1885   :  { %v4740_v21 = vadd.f32 %v2848_v63, %v5858_v50  ;;  %v3967_v63 = vld [vmem:[%s6204_s12 + $0x4] sm:$0x3] }
0x1886   :  { %v3952_v22 = vmul.f32 -1.442695, %v4739_v16  ;;  %v3188_v16 = vld [vmem:[%s6204_s12] sm:$0x3] }
0x1887   :  { %v3953_v23 = vmul.f32 -1.442695, %v4740_v21 }
0x1888   :  { %4959 = vpow2.f32 %v3952_v22 }
0x1889   :  { %4961 = vpow2.f32 %v3953_v23 }
0x188a   :  { %4963 = vtanh.f32 %v4740_v21 }
0x1892   :  { %v4960_v29 = vpop.eup %4959 }
0x1893   :  { %v4962_v30 = vpop.eup %4961  ;;  %v2861_v37 = vadd.f32 1.0, %v4960_v29  ;;  %v5272_v29 = vmov 0.0|0.0  }
0x1894   :  { %v2862_v40 = vadd.f32 1.0, %v4962_v30  ;;  %v4964_v44 = vpop.eup %4963  ;;  %4619 = vmatprep.subr.bf16.mxu0 %v5272_v29  ;;  %v215_v30 = vld [vmem:[#allocation16] sm:$0xff] }
0x1896   :  { %4965 = vrcp.f32 %v2862_v40 }
0x1897   :  { %4967 = vrcp.f32 %v2861_v37  ;;  %v216_v37 = vld [vmem:[#allocation16 + $0x8] sm:$0xff] }
0x1898   :  { %v6018_v40 = vpack.c.bf16 %v216_v37, %v215_v30  ;;  %v3973_v37 = vld [vmem:[%s6204_s12 + $0xa] sm:$0x3] }
0x18a0   :  { %v4966_v45 = vpop.eup %4965 }
0x18a1   :  { %v4968_v24 = vpop.eup %4967  ;;  %v2868_v47 = vsel %vm230_vm2, %v4964_v44, %v4966_v45  ;;  %v217_v44 = vld [vmem:[#allocation16 + $0x10] sm:$0xff]  ;;  %v218_v45 = vld [vmem:[#allocation16 + $0x18] sm:$0xff] }
0x18a2   :  { %v2870_v42 = vmul.f32 %v4968_v24, %v2868_v47  ;;  %v2869_v49 = vmul.f32 %v4968_v24, %v2772_v11  ;;  %v6022_v24 = vpack.c.bf16 %v218_v45, %v217_v44 }
0x18a4   :  { %2872 = vrot.lane.b32.xlu1 %v2870_v42, %s5271_s9  ;;  %v219_v42 = vld [vmem:[#allocation16 + $0x20] sm:$0xff] }
0x1916   :  { %v2873_v51 = vpop.permute.xlu1 %2872 }
0x1917   :  { %v2875_v52 = vadd.f32 %v2873_v51, %v2869_v49  ;;  %v220_v49 = vld [vmem:[#allocation16 + $0x28] sm:$0xff] }
0x1919   :  { %4969 = vtanh.f32 %v2875_v52 }
0x1923   :  { %v4970_v58 = vpop.eup %4969 }
0x1924   :  { %v5977_v60 = vmul.f32 %v4970_v58, %v2868_v47  ;;  %v3965_v58 = vld [vmem:[%s6204_s12 + $0x2] sm:$0x3] }
0x1926   :  { %2879 = vrot.lane.b32.xlu0 %v5977_v60, %s5271_s9 }
0x1998   :  { %v2880_v53 = vpop.permute.xlu0 %2879 }
0x1999   :  { %3954 = vmatmul.mubr.msk.f32.vlgmr.msra.gmra.mrb[12].mxu1 %vm854_vm1, %v2880_v53  ;;  %v221_v53 = vld [vmem:[#allocation16 + $0x30] sm:$0xff] }
0x199a   :  { %4606 = vmatpush1.bf16.msra.mxu1 %v5805_v12  ;;  %3153 = vmatprep.mubr.f32.mxu1 %v5270_v0 }
0x199b   :  { %4608 = vmatprep.subr.bf16.mxu1 %v5808_v14 }
0x199e   :  { %4610 = vmatpush1.bf16.msra.mxu1 %v5812_v17 }
0x199f   :  { %4612 = vmatprep.subr.bf16.mxu1 %v5816_v18 }
0x19a2   :  { %4614 = vmatpush1.bf16.msra.mxu1 %v5819_v27 }
0x19a3   :  { %4616 = vmatprep.subr.bf16.mxu1 %v5822_v28 }
0x19a6   :  { %4618 = vmatpush1.bf16.msra.mxu1 %v5825_v33 }
0x19a7   :  { %4631 = vmatprep.subr.bf16.mxu1 %v5272_v29 }
0x1a6c   :  { %v2949_v61 = vpop.f32.mrb[12].mxu1 }
0x1a6d   :  { %v4741_v62 = vadd.f32 %v2949_v61, %v5854_v43  ;;  %v2951_v1 = vpop.f32.mrb[13].mxu1  ;;  %v222_v61 = vld [vmem:[#allocation16 + $0x38] sm:$0xff] }
0x1a6e   :  { %v4742_v12 = vadd.f32 %v2951_v1, %v5858_v50  ;;  %v3969_v1 = vld [vmem:[%s6204_s12 + $0x6] sm:$0x3] }
0x1a6f   :  { %v3955_v36 = vmul.f32 -1.442695, %v4741_v62  ;;  %v6034_v62 = vpack.c.bf16 %v222_v61, %v221_v53 }
0x1a70   :  { %v3956_v25 = vmul.f32 -1.442695, %v4742_v12 }
0x1a71   :  { %4971 = vpow2.f32 %v3955_v36 }
0x1a72   :  { %4973 = vpow2.f32 %v3956_v25  ;;  %v3975_v25 = vld [vmem:[%s6204_s12 + $0xc] sm:$0x3] }
0x1a73   :  { %4975 = vtanh.f32 %v4742_v12  ;;  %v3971_v12 = vld [vmem:[%s6204_s12 + $0x8] sm:$0x3] }
0x1a7b   :  { %v4972_v14 = vpop.eup %4971 }
0x1a7c   :  { %v4974_v17 = vpop.eup %4973  ;;  %v2964_v38 = vadd.f32 1.0, %v4972_v14 }
0x1a7d   :  { %v2965_v18 = vadd.f32 1.0, %v4974_v17  ;;  %v4976_v27 = vpop.eup %4975 }
0x1a7f   :  { %4977 = vrcp.f32 %v2965_v18 }
0x1a80   :  { %4979 = vrcp.f32 %v2964_v38 }
0x1a89   :  { %v4978_v28 = vpop.eup %4977 }
0x1a8a   :  { %v4980_v33 = vpop.eup %4979  ;;  %v2971_v39 = vsel %vm230_vm2, %v4976_v27, %v4978_v28 }
0x1a8b   :  { %v2973_v10 = vmul.f32 %v4980_v33, %v2971_v39  ;;  %v2972_v2 = vmul.f32 %v4980_v33, %v2875_v52  ;;  %v6026_v52 = vpack.c.bf16 %v220_v49, %v219_v42  ;;  %v3977_v42 = vld [vmem:[%s6204_s12 + $0xe] sm:$0x3]  ;;  %s5274_s12 = smov [#allocation17]  }
0x1a8d   :  { %2975 = vrot.lane.b32.xlu1 %v2973_v10, %s5271_s9 }
0x1aff   :  { %v2976_v31 = vpop.permute.xlu1 %2975 }
0x1b00   :  { %v2978_v32 = vadd.f32 %v2976_v31, %v2972_v2 }
0x1b02   :  { %4981 = vtanh.f32 %v2978_v32 }
0x1b0c   :  { %v4982_v3 = vpop.eup %4981 }
0x1b0d   :  { %v5995_v4 = vmul.f32 %v4982_v3, %v2971_v39 }
0x1b0f   :  { %2982 = vrot.lane.b32.xlu0 %v5995_v4, %s5271_s9 }
0x1b81   :  { %v2983_v5 = vpop.permute.xlu0 %2982 }
0x1b82   :  { %3957 = vmatmul.mubr.msk.f32.vlgmr.msra.gmra.mrb[14].mxu0 %vm854_vm1, %v2983_v5 }
0x1b83   :  { %4621 = vmatpush3.bf16.msra.mxu0 %v6018_v40  ;;  %4067 = vmatprep.mubr.msk.f32.mxu0 %vm5273_vm3, %v5270_v0 }
0x1b84   :  { %4622 = vmatprep.subr.bf16.mxu0 %v5272_v29 }
0x1b87   :  { %4624 = vmatpush3.bf16.msra.mxu0 %v6022_v24 }
0x1b88   :  { %4625 = vmatprep.subr.bf16.mxu0 %v5272_v29 }
0x1b8b   :  { %4627 = vmatpush3.bf16.msra.mxu0 %v6026_v52 }
0x1b8c   :  { %4628 = vmatprep.subr.bf16.mxu0 %v5272_v29 }
0x1b8f   :  { %4630 = vmatpush3.bf16.msra.mxu0 %v6034_v62 }
0x1b90   :  { %4643 = vmatprep.subr.bf16.mxu0 %v5272_v29 }
0x1c55   :  { %v3052_v8 = vpop.f32.mrb[14].mxu0 }
0x1c56   :  { %v4743_v46 = vadd.f32 %v3052_v8, %v5854_v43  ;;  %v3054_v48 = vpop.f32.mrb[15].mxu0 }
0x1c57   :  { %v4744_v54 = vadd.f32 %v3054_v48, %v5858_v50 }
0x1c58   :  { %v3958_v59 = vmul.f32 -1.442695, %v4743_v46 }
0x1c59   :  { %v3959_v19 = vmul.f32 -1.442695, %v4744_v54 }
0x1c5a   :  { %4983 = vpow2.f32 %v3958_v59 }
0x1c5b   :  { %4985 = vpow2.f32 %v3959_v19 }
0x1c5c   :  { %4987 = vtanh.f32 %v4744_v54 }
0x1c64   :  { %v4984_v6 = vpop.eup %4983 }
0x1c65   :  { %v4986_v20 = vpop.eup %4985  ;;  %v3067_v26 = vadd.f32 1.0, %v4984_v6 }
0x1c66   :  { %v3068_v35 = vadd.f32 1.0, %v4986_v20  ;;  %v4988_v9 = vpop.eup %4987 }
0x1c68   :  { %4989 = vrcp.f32 %v3068_v35 }
0x1c69   :  { %4991 = vrcp.f32 %v3067_v26 }
0x1c72   :  { %v4990_v11 = vpop.eup %4989 }
0x1c73   :  { %v4992_v7 = vpop.eup %4991  ;;  %v3074_v15 = vsel %vm230_vm2, %v4988_v9, %v4990_v11 }
0x1c74   :  { %v3076_v13 = vmul.f32 %v4992_v7, %v3074_v15  ;;  %v3075_v21 = vmul.f32 %v4992_v7, %v2978_v32 }
0x1c76   :  { %3078 = vrot.lane.b32.xlu1 %v3076_v13, %s5271_s9 }
0x1c7a   :  { %3190 = vrot.lane.b32.xlu1 %v3188_v16, %s5271_s9 }
0x1c7e   :  { %3365 = vrot.lane.b32.xlu1 %v3967_v63, %s5271_s9 }
0x1ce8   :  { %v3079_v22 = vpop.permute.xlu1 %3078 }
0x1ce9   :  { %v6013_v23 = vadd.f32 %v3079_v22, %v3075_v21 }
0x1ceb   :  { %4993 = vtanh.f32 %v6013_v23 }
0x1cec   :  { %4995 = vtanh.f32 %v5878_v56  ;;  %v3191_v36 = vpop.permute.xlu1 %3190 }
0x1ced   :  { %4997 = vtanh.f32 %v5940_v41 }
0x1cee   :  { %4999 = vtanh.f32 %v5921_v34 }
0x1cef   :  { %5001 = vtanh.f32 %v5959_v57 }
0x1cf0   :  { %v3366_v56 = vpop.permute.xlu1 %3365  ;;  %5003 = vtanh.f32 %v5977_v60 }
0x1cf5   :  { %v4994_v47 = vpop.eup %4993 }
0x1cf6   :  { %v3083_v51 = vmul.f32 %v4994_v47, %v3074_v15  ;;  %v4996_v14 = vpop.eup %4995  ;;  %v6115_v15 = vld [vmem:[%s6202_s10] ss:$0 sm:$0xff] }
0x1cf7   :  { %v3193_v17 = vmul.f32 %v4996_v14, %v3191_v36  ;;  %v4998_v38 = vpop.eup %4997 }
0x1cf8   :  { %3085 = vrot.lane.b32.xlu0 %v3083_v51, %s5271_s9  ;;  %v3368_v18 = vmul.f32 %v4998_v38, %v3366_v56  ;;  %v5000_v27 = vpop.eup %4999  ;;  %5005 = vtanh.f32 %v3083_v51 }
0x1cf9   :  { %v5002_v34 = vpop.eup %5001 }
0x1cfa   :  { %v5004_v60 = vpop.eup %5003 }
0x1cfc   :  { %3280 = vrot.lane.b32.xlu0 %v3965_v58, %s5271_s9 }
0x1d00   :  { %3450 = vrot.lane.b32.xlu0 %v3969_v1, %s5271_s9 }
0x1d02   :  { %v5006_v31 = vpop.eup %5005 }
0x1d04   :  { %3535 = vrot.lane.b32.xlu0 %v3971_v12, %s5271_s9 }
0x1d08   :  { %3705 = vrot.lane.b32.xlu0 %v3975_v25, %s5271_s9 }
0x1d0c   :  { %3201 = vrot.lane.b32.xlu0 %v3193_v17, %s5271_s9 }
0x1d10   :  { %3370 = vrot.lane.b32.xlu0 %v3368_v18, %s5271_s9 }
0x1d6a   :  { %v3086_v41 = vpop.permute.xlu0 %3085 }
0x1d6b   :  { %3960 = vmatmul.mubr.msk.f32.vlgmr.msra.gmra.mrb[14].mxu1 %vm854_vm1, %v3086_v41 }
0x1d6c   :  { %4633 = vmatpush3.bf16.msra.mxu1 %v6018_v40  ;;  %4086 = vmatprep.mubr.msk.f32.mxu1 %vm5273_vm3, %v5270_v0 }
0x1d6d   :  { %4634 = vmatprep.subr.bf16.mxu1 %v5272_v29 }
0x1d6e   :  { %v3281_v28 = vpop.permute.xlu0 %3280 }
0x1d6f   :  { %v6065_v33 = vmul.f32 %v5000_v27, %v3281_v28 }
0x1d70   :  { %4636 = vmatpush3.bf16.msra.mxu1 %v6022_v24 }
0x1d71   :  { %4637 = vmatprep.subr.bf16.mxu1 %v5272_v29 }
0x1d72   :  { %v3451_v57 = vpop.permute.xlu0 %3450 }
0x1d73   :  { %v6069_v39 = vmul.f32 %v5002_v34, %v3451_v57 }
0x1d74   :  { %4639 = vmatpush3.bf16.msra.mxu1 %v6026_v52 }
0x1d75   :  { %4640 = vmatprep.subr.bf16.mxu1 %v5272_v29 }
0x1d76   :  { %v3536_v10 = vpop.permute.xlu0 %3535 }
0x1d77   :  { %v3538_v2 = vmul.f32 %v5004_v60, %v3536_v10 }
0x1d78   :  { %4642 = vmatpush3.bf16.msra.mxu1 %v6034_v62 }
0x1d79   :  { %3540 = vrot.lane.b32.xlu0 %v3538_v2, %s5271_s9  ;;  %4655 = vmatprep.subr.bf16.mxu1 %v5272_v29 }
0x1d7a   :  { %v3706_v32 = vpop.permute.xlu0 %3705 }
0x1d7b   :  { %v3708_v3 = vmul.f32 %v5006_v31, %v3706_v32 }
0x1d7d   :  { %3710 = vrot.lane.b32.xlu0 %v3708_v3, %s5271_s9 }
0x1d7e   :  { %v3202_v5 = vpop.permute.xlu0 %3201 }
0x1d7f   :  { %4068 = vmatmul.mubr.msk.f32.vlgmr.msra.gmra.mrb[16].mxu0 %vm854_vm1, %v3202_v5 }
0x1d80   :  { %4645 = vmatpush3.bf16.msra.mxu0 %v6018_v40  ;;  %4105 = vmatprep.mubr.msk.f32.mxu0 %vm5273_vm3, %v5270_v0 }
0x1d81   :  { %4646 = vmatprep.subr.bf16.mxu0 %v5272_v29 }
0x1d82   :  { %v3371_v8 = vpop.permute.xlu0 %3370 }
0x1d84   :  { %4648 = vmatpush3.bf16.msra.mxu0 %v6022_v24 }
0x1d85   :  { %4649 = vmatprep.subr.bf16.mxu0 %v5272_v29 }
0x1d88   :  { %4651 = vmatpush3.bf16.msra.mxu0 %v6026_v52 }
0x1d89   :  { %4652 = vmatprep.subr.bf16.mxu0 %v5272_v29 }
0x1d8c   :  { %4654 = vmatpush3.bf16.msra.mxu0 %v6034_v62 }
0x1d8d   :  { %4667 = vmatprep.subr.bf16.mxu0 %v5272_v29 }
0x1d8f   :  { %4106 = vmatmul.mubr.msk.f32.vlgmr.msra.gmra.mrb[18].mxu0 %vm854_vm1, %v3371_v8 }
0x1d90   :  { %4669 = vmatpush3.bf16.msra.mxu0 %v6018_v40  ;;  %4143 = vmatprep.mubr.msk.f32.mxu0 %vm5273_vm3, %v5270_v0 }
0x1d91   :  { %4670 = vmatprep.subr.bf16.mxu0 %v5272_v29 }
0x1d94   :  { %4672 = vmatpush3.bf16.msra.mxu0 %v6022_v24 }
0x1d95   :  { %4673 = vmatprep.subr.bf16.mxu0 %v5272_v29 }
0x1d98   :  { %4675 = vmatpush3.bf16.msra.mxu0 %v6026_v52 }
0x1d99   :  { %4676 = vmatprep.subr.bf16.mxu0 %v5272_v29 }
0x1d9c   :  { %4678 = vmatpush3.bf16.msra.mxu0 %v6034_v62 }
0x1d9d   :  { %4691 = vmatprep.subr.bf16.mxu0 %v5272_v29 }
0x1deb   :  { %v3541_v46 = vpop.permute.xlu0 %3540 }
0x1dec   :  { %4144 = vmatmul.mubr.msk.f32.vlgmr.msra.gmra.mrb[20].mxu0 %vm854_vm1, %v3541_v46 }
0x1ded   :  { %4693 = vmatpush3.bf16.msra.mxu0 %v6018_v40  ;;  %4181 = vmatprep.mubr.msk.f32.mxu0 %vm5273_vm3, %v5270_v0 }
0x1dee   :  { %4694 = vmatprep.subr.bf16.mxu0 %v5272_v29 }
0x1def   :  { %v3711_v48 = vpop.permute.xlu0 %3710 }
0x1df1   :  { %4696 = vmatpush3.bf16.msra.mxu0 %v6022_v24 }
0x1df2   :  { %4697 = vmatprep.subr.bf16.mxu0 %v5272_v29 }
0x1df5   :  { %4699 = vmatpush3.bf16.msra.mxu0 %v6026_v52 }
0x1df6   :  { %4700 = vmatprep.subr.bf16.mxu0 %v5272_v29 }
0x1df9   :  { %4702 = vmatpush3.bf16.msra.mxu0 %v6034_v62 }
0x1dfc   :  { %4182 = vmatmul.mubr.msk.f32.vlgmr.msra.gmra.mrb[22].mxu0 %vm854_vm1, %v3711_v48 }
0x1e3e   :  { %v3155_v54 = vpop.f32.mrb[14].mxu1 }
0x1e3f   :  { %v4745_v59 = vadd.f32 %v3155_v54, %v5854_v43  ;;  %v3157_v19 = vpop.f32.mrb[15].mxu1 }
0x1e40   :  { %v4746_v6 = vadd.f32 %v3157_v19, %v5858_v50 }
0x1e41   :  { %v3961_v20 = vmul.f32 -1.442695, %v4745_v59 }
0x1e42   :  { %v3962_v26 = vmul.f32 -1.442695, %v4746_v6 }
0x1e43   :  { %5007 = vpow2.f32 %v3961_v20 }
0x1e44   :  { %5009 = vpow2.f32 %v3962_v26 }
0x1e45   :  { %5011 = vtanh.f32 %v4746_v6 }
0x1e4d   :  { %v5008_v35 = vpop.eup %5007 }
0x1e4e   :  { %v5010_v9 = vpop.eup %5009  ;;  %v3170_v11 = vadd.f32 1.0, %v5008_v35 }
0x1e4f   :  { %v3171_v7 = vadd.f32 1.0, %v5010_v9  ;;  %v5012_v16 = vpop.eup %5011 }
0x1e51   :  { %5013 = vrcp.f32 %v3171_v7 }
0x1e52   :  { %5015 = vrcp.f32 %v3170_v11  ;;  %v3271_v43 = vpop.f32.mrb[16].mxu0 }
0x1e53   :  { %v3272_v13 = vadd.f32 %v6115_v15, %v3271_v43  ;;  %v4069_v50 = vpop.f32.mrb[17].mxu0  ;;  %5017 = vtanh.f32 %v5995_v4 }
0x1e55   :  { %3275 = vst [vmem:[#allocation17] sm:$0x3] %v3272_v13 }
0x1e5b   :  { %v5014_v63 = vpop.eup %5013 }
0x1e5c   :  { %v5016_v21 = vpop.eup %5015  ;;  %v3177_v22 = vsel %vm230_vm2, %v5012_v16, %v5014_v63 }
0x1e5d   :  { %v3179_v30 = vmul.f32 %v5016_v21, %v3177_v22  ;;  %v3178_v1 = vmul.f32 %v5016_v21, %v6013_v23  ;;  %v5018_v25 = vpop.eup %5017 }
0x1e5f   :  { %3181 = vrot.lane.b32.xlu1 %v3179_v30, %s5271_s9 }
0x1e62   :  { %v3440_v44 = vpop.f32.mrb[18].mxu0 }
0x1e63   :  { %v3441_v45 = vadd.f32 %v6115_v15, %v3440_v44  ;;  %v4107_v47 = vpop.f32.mrb[19].mxu0  ;;  %3620 = vrot.lane.b32.xlu1 %v3973_v37, %s5271_s9 }
0x1e65   :  { %3445 = vst [vmem:[#allocation17 + $0x4] sm:$0x3] %v3441_v45 }
0x1e67   :  { %3790 = vrot.lane.b32.xlu1 %v3977_v42, %s5271_s9 }
0x1e6b   :  { %3285 = vrot.lane.b32.xlu1 %v6065_v33, %s5271_s9 }
0x1e6f   :  { %3455 = vrot.lane.b32.xlu1 %v6069_v39, %s5271_s9 }
0x1ebf   :  { %v3610_v55 = vpop.f32.mrb[20].mxu0 }
0x1ec0   :  { %v3611_v49 = vadd.f32 %v6115_v15, %v3610_v55  ;;  %v4145_v51 = vpop.f32.mrb[21].mxu0 }
0x1ec2   :  { %3615 = vst [vmem:[#allocation17 + $0x8] sm:$0x3] %v3611_v49 }
0x1ecf   :  { %v3780_v58 = vpop.f32.mrb[22].mxu0 }
0x1ed0   :  { %v3781_v53 = vadd.f32 %v6115_v15, %v3780_v58  ;;  %v4183_v61 = vpop.f32.mrb[23].mxu0 }
0x1ed1   :  { %v3182_v12 = vpop.permute.xlu1 %3181 }
0x1ed2   :  { %3785 = vst [vmem:[#allocation17 + $0xc] sm:$0x3] %v3781_v53  ;;  %v3184_v36 = vadd.f32 %v3182_v12, %v3178_v1 }
0x1ed4   :  { %5019 = vtanh.f32 %v3184_v36 }
0x1ed5   :  { %v3621_v14 = vpop.permute.xlu1 %3620 }
0x1ed6   :  { %v3623_v17 = vmul.f32 %v5018_v25, %v3621_v14 }
0x1ed8   :  { %3625 = vrot.lane.b32.xlu1 %v3623_v17, %s5271_s9 }
0x1ed9   :  { %v3791_v56 = vpop.permute.xlu1 %3790 }
0x1edd   :  { %v3286_v38 = vpop.permute.xlu1 %3285 }
0x1ede   :  { %v5020_v18 = vpop.eup %5019  ;;  %4087 = vmatmul.mubr.msk.f32.vlgmr.msra.gmra.mrb[16].mxu1 %vm854_vm1, %v3286_v38 }
0x1edf   :  { %v3186_v4 = vmul.f32 %v5020_v18, %v3177_v22  ;;  %4657 = vmatpush3.bf16.msra.mxu1 %v6018_v40  ;;  %4124 = vmatprep.mubr.msk.f32.mxu1 %vm5273_vm3, %v5270_v0 }
0x1ee0   :  { %4658 = vmatprep.subr.bf16.mxu1 %v5272_v29 }
0x1ee1   :  { %5021 = vtanh.f32 %v3186_v4  ;;  %v3456_v27 = vpop.permute.xlu1 %3455 }
0x1ee3   :  { %4660 = vmatpush3.bf16.msra.mxu1 %v6022_v24 }
0x1ee4   :  { %4661 = vmatprep.subr.bf16.mxu1 %v5272_v29 }
0x1ee7   :  { %4663 = vmatpush3.bf16.msra.mxu1 %v6026_v52 }
0x1ee8   :  { %4664 = vmatprep.subr.bf16.mxu1 %v5272_v29 }
0x1eeb   :  { %v5022_v23 = vpop.eup %5021  ;;  %4666 = vmatpush3.bf16.msra.mxu1 %v6034_v62 }
0x1eec   :  { %v3793_v41 = vmul.f32 %v5022_v23, %v3791_v56  ;;  %4679 = vmatprep.subr.bf16.mxu1 %v5272_v29 }
0x1eee   :  { %4125 = vmatmul.mubr.msk.f32.vlgmr.msra.gmra.mrb[18].mxu1 %vm854_vm1, %v3456_v27  ;;  %3795 = vrot.lane.b32.xlu1 %v3793_v41, %s5271_s9  ;;  %s3876_s9 = sshll.u32 %s5274_s12, 4  ;;  %s3877_s9 = int_to_ptr.vmem [resolvable:$true] %s3876_s9 }
0x1eef   :  { %4681 = vmatpush3.bf16.msra.mxu1 %v6018_v40  ;;  %4162 = vmatprep.mubr.msk.f32.mxu1 %vm5273_vm3, %v5270_v0  ;;  %s5221_s6 = scalar_lea.vmem %s3877_s9, 256  ;;  %p5226_p3 = scmp.lt.s32.totalorder %s3877_s9, %s3877_s9 }
0x1ef0   :  { %4682 = vmatprep.subr.bf16.mxu1 %v5272_v29  ;;  %p5222_p2 = scmp.ne.s32.totalorder %s3877_s9, %s5221_s6  ;;  %p5227_p4 = scmp.lt.s32.totalorder %s5221_s6, %s5221_s6 }
0x1ef2   :  { %p5228_p5 = por %p5227_p4, %p5226_p3 }
0x1ef3   :  { %4684 = vmatpush3.bf16.msra.mxu1 %v6022_v24 }
0x1ef4   :  { %4685 = vmatprep.subr.bf16.mxu1 %v5272_v29  ;;  %p5229_p6 = pnand %p5228_p5, %p5222_p2 }
0x1ef7   :  { %4687 = vmatpush3.bf16.msra.mxu1 %v6026_v52 }
0x1ef8   :  { %4688 = vmatprep.subr.bf16.mxu1 %v5272_v29 }
0x1efb   :  { %4690 = vmatpush3.bf16.msra.mxu1 %v6034_v62 }
0x1efc   :  { %4703 = vmatprep.subr.bf16.mxu1 %v5272_v29 }
0x1f4a   :  { %v3626_v28 = vpop.permute.xlu1 %3625 }
0x1f4b   :  { %4163 = vmatmul.mubr.msk.f32.vlgmr.msra.gmra.mrb[20].mxu1 %vm854_vm1, %v3626_v28 }
0x1f4c   :  { %4705 = vmatpush3.bf16.msra.mxu1 %v6018_v40  ;;  %4200 = vmatprep.mubr.msk.f32.mxu1 %vm5273_vm3, %v5270_v0 }
0x1f4d   :  { %4706 = vmatprep.subr.bf16.mxu1 %v5272_v29 }
0x1f50   :  { %4708 = vmatpush3.bf16.msra.mxu1 %v6022_v24 }
0x1f51   :  { %4709 = vmatprep.subr.bf16.mxu1 %v5272_v29 }
0x1f54   :  { %4711 = vmatpush3.bf16.msra.mxu1 %v6026_v52 }
0x1f55   :  { %4712 = vmatprep.subr.bf16.mxu1 %v5272_v29 }
0x1f58   :  { %4714 = vmatpush3.bf16.msra.mxu1 %v6034_v62 }
0x1f60   :  { %v3796_v33 = vpop.permute.xlu1 %3795 }
0x1f61   :  { %4201 = vmatmul.mubr.msk.f32.vlgmr.msra.gmra.mrb[22].mxu1 %vm854_vm1, %v3796_v33 }
0x1fb1   :  { %v3355_v34 = vpop.f32.mrb[16].mxu1 }
0x1fb2   :  { %v3356_v40 = vadd.f32 %v6115_v15, %v3355_v34  ;;  %v4088_v57 = vpop.f32.mrb[17].mxu1 }
0x1fb4   :  { %3360 = vst [vmem:[#allocation17 + $0x2] sm:$0x3] %v3356_v40 }
0x1fc1   :  { %v3525_v0 = vpop.f32.mrb[18].mxu1 }
0x1fc2   :  { %v3526_v39 = vadd.f32 %v6115_v15, %v3525_v0  ;;  %v4126_v24 = vpop.f32.mrb[19].mxu1 }
0x1fc4   :  { %3530 = vst [vmem:[#allocation17 + $0x6] sm:$0x3] %v3526_v39 }
0x201e   :  { %v3695_v60 = vpop.f32.mrb[20].mxu1 }
0x201f   :  { %v3696_v52 = vadd.f32 %v6115_v15, %v3695_v60  ;;  %v4164_v10 = vpop.f32.mrb[21].mxu1 }
0x2021   :  { %3700 = vst [vmem:[#allocation17 + $0xa] sm:$0x3] %v3696_v52 }
0x2034   :  { %v3865_v29 = vpop.f32.mrb[22].mxu1 }
0x2035   :  { %v3866_v62 = vadd.f32 %v6115_v15, %v3865_v29  ;;  %v4202_v2 = vpop.f32.mrb[23].mxu1 }
0x2037   :  { %3870 = vst [vmem:[#allocation17 + $0xe] sm:$0x3] %v3866_v62 }
0x2038   :  { %5232 = shalt.err (!%p5229_p6)
}
0x2039   :  { %s5233_s24 = scalar_lea.hbm %s6205_s13, 256 }
0x203a   :  { %p5234_p7 = scmp.ne.s32.totalorder %s6205_s13, %s5233_s24  ;;  %p5237_p8 = scmp.lt.u32.totalorder %s5233_s24, %s6205_s13 }
0x203c   :  { %p5239_p9 = pnand %p5237_p8, %p5234_p7 }
0x203e   :  { %5242 = shalt.err (!%p5239_p9)
}
0x203f   :  { %3882 = dma.vmem_to_hbm [thread:$0]  %s3877_s9, 256, %s6205_s13, [#allocation4], %s5262_s8, %s5262_s8, %s5263_s30  }
0x2040   :  { %5253 = dma.done.wait [#allocation4], 256  }
0x2041   :  { %5254 = vsyncadd [#allocation4], 4294967040 }
0x2042   :  { %3886 = vsyncpa [#allocation3], 1 }
0x2043   :  { %3887 = vsyncpa [#allocation6], 1 }
0x2044   :  { %3888 = vsyncpa [#allocation9], 1 }
0x2045   :  { %3889 = vsyncpa [#allocation12], 1 }
0x2046   :  { %3890 = vsyncpa [#allocation15], 1 }
0x2047   :  { %3891 = vsyncpa [#allocation4], 1 }

</bundles_post_ra>
